<compile_context>
chip_gen: v7x
topology: tpu7x:2x2x1
jax: 0.10.0
libtpu: 0.0.40
codegen_flags: <defaults>
</compile_context>

<pallas_src>
import numpy as np
import jax
import jax.numpy as jnp
from jax.experimental import pallas as pl
from jax.experimental.pallas import tpu as pltpu

TARGET_IRREPS = ((2, 0), (2, 1), (2, 2))   # (mul, l)
D_OUT = sum(mul * (2 * l + 1) for mul, l in TARGET_IRREPS)   # 18
RCUT = 5.0
EPS = 1e-7
LANE = 128
SUB = 8

SQRT3 = float(np.sqrt(3.0))
SQRT5 = float(np.sqrt(5.0))
SQRT15 = float(np.sqrt(15.0))


# ---------- init-time constants: spherical Bessel zeros & normalizers --------
def _sph_jn_np(l, x):
    s, c = np.sin(x), np.cos(x)
    if l == 0:
        return s / x
    if l == 1:
        return s / x**2 - c / x
    if l == 2:
        return (3.0 / x**3 - 1.0 / x) * s - 3.0 * c / x**2
    if l == 3:
        return (15.0 / x**4 - 6.0 / x**2) * s - (15.0 / x**3 - 1.0 / x) * c
    raise NotImplementedError(l)


def _bisect(f, a, b, iters=200):
    fa = f(a)
    for _ in range(iters):
        m = 0.5 * (a + b)
        fm = f(m)
        if fa * fm <= 0.0:
            b = m
        else:
            a, fa = m, fm
    return 0.5 * (a + b)


def _jn_zeros(n, k):
    """First k zeros of spherical Bessel j_l for l = 0..n-1 (zero interlacing)."""
    zeros = [np.arange(1, k + n) * np.pi]
    for l in range(1, n):
        prev = zeros[-1]
        cur = [_bisect(lambda r, _l=l: _sph_jn_np(_l, r), prev[j], prev[j + 1])
               for j in range(len(prev) - 1)]
        zeros.append(np.asarray(cur))
    return [np.asarray(z[:k], dtype=np.float64) for z in zeros]


def _bessel_consts(irreps):
    max_l = max(l for _, l in irreps)
    max_freq = max(mul for mul, _ in irreps)
    zeros = _jn_zeros(max_l + 1, max_freq)
    norms = [1.0 / np.sqrt(0.5 * _sph_jn_np(l + 1, zeros[l]) ** 2)
             for l in range(max_l + 1)]
    return zeros, norms


# Computed once at import time (pure numpy; baked into the kernel as constants).
ZEROS, NORMS = _bessel_consts(TARGET_IRREPS)


# ------------------------------ Pallas kernel --------------------------------
def _make_kernel(irreps, zeros, norms, rcut, eps):
    inv_rcut = 1.0 / rcut
    eps_s = eps * inv_rcut

    def kernel(in_ref, out_ref):
        # in_ref: (4, R, 128) -> rows 0..2 direction, row 3 length.
        x = in_ref[0]                                      # (R, 128)
        y = in_ref[1]
        z = in_ref[2]
        length = in_ref[3]

        # normalize=True (inputs assumed nonzero, matching e3nn behaviour)
        inv_r = jax.lax.rsqrt(x * x + y * y + z * z)
        ux, uy, uz = x * inv_r, y * inv_r, z * inv_r

        # bessel argument scale; single true divide for the whole tile
        xc = length * inv_rcut
        t = xc + eps_s
        inv_t = 1.0 / t

        # DimeNet polynomial cutoff, p = 6: 1 - 28 x^6 + 48 x^7 - 21 x^8 (x < 1)
        x3 = xc * xc * xc
        x6 = x3 * x3
        cut = 1.0 + x6 * (-28.0 + xc * (48.0 - 21.0 * xc))
        cut = jnp.where(xc < 1.0, cut, 0.0)

        # e3ElementWise: per-irrep-copy multiply of the SH block by its bessel
        # weight; each output feature row is a full (R,128) unmasked store.
        row = 0
        comps = ()
        for mul, l in irreps:
            dim = 2 * l + 1
            if l == 1:
                # e3nn real SH, 'component' normalization
                comps = (SQRT3 * ux, SQRT3 * uy, SQRT3 * uz)
            elif l == 2:
                ux2, uy2, uz2 = ux * ux, uy * uy, uz * uz
                comps = (SQRT15 * (ux * uz),
                         SQRT15 * (ux * uy),
                         SQRT5 * (uy2 - 0.5 * (ux2 + uz2)),
                         SQRT15 * (uy * uz),
                         (0.5 * SQRT15) * (uz2 - ux2))
            for f in range(mul):
                z_lf = float(zeros[l][f])
                norm = float(norms[l][f])
                u = z_lf * t
                inv_u = (1.0 / z_lf) * inv_t               # multiply, not divide
                s = jnp.sin(u)
                if l == 0:
                    j = s * inv_u
                elif l == 1:
                    c = jnp.cos(u)
                    j = inv_u * (s * inv_u - c)
                else:  # l == 2
                    c = jnp.cos(u)
                    j = inv_u * (inv_u * (3.0 * (s * inv_u) - 3.0 * c) - s)
                w = (norm * j) * cut                       # (R, 128)
                if l == 0:
                    out_ref[row] = w
                else:
                    for m in range(dim):
                        out_ref[row + m] = comps[m] * w
                row += dim

    return kernel


def _choose_rows(n):
    """Pick the tile row count R (multiple of 8 sublanes of 128 lanes) and the
    padded number of 128-edge rows."""
    n_rows = pl.cdiv(max(n, 1), LANE)
    n_rows = max(SUB, pl.cdiv(n_rows, SUB) * SUB)          # sublane-align
    r = SUB
    for cand in (64, 32, 16, 8):                           # up to 8192 edges/step
        if cand <= n_rows and (pl.cdiv(n_rows, cand) * cand - n_rows) * 8 <= n_rows:
            r = cand
            break
    # keep >= 2 grid steps when the input allows it (megacore + DMA overlap)
    if n_rows // r < 2 and n_rows >= 2 * SUB:
        r = max(SUB, (n_rows // 2) // SUB * SUB)
    n_rows_pad = pl.cdiv(n_rows, r) * r
    return r, n_rows_pad


@jax.jit
def spherical_basis(direction, length):
    """direction: (N, 3) float32, length: (N,) float32 -> (N, D_OUT) float32."""
    direction = jnp.asarray(direction, jnp.float32)
    length = jnp.asarray(length, jnp.float32)
    n = direction.shape[0]
    r_tile, n_rows_pad = _choose_rows(n)
    n_pad = n_rows_pad * LANE

    # Fused feature-major input: rows 0..2 = direction^T, row 3 = length.
    # Pad edges with 1.0 (direction (1,1,1), length 1) so rsqrt / 1/t stay
    # finite; padded edges are sliced off on return.
    inp = jnp.concatenate([direction.T, length[None, :]], axis=0)     # (4, n)
    inp = jnp.pad(inp, ((0, 0), (0, n_pad - n)), constant_values=1.0)
    inp = inp.reshape(4, n_rows_pad, LANE)

    kernel = _make_kernel(TARGET_IRREPS, ZEROS, NORMS, RCUT, EPS)

    out = pl.pallas_call(
        kernel,
        out_shape=jax.ShapeDtypeStruct((D_OUT, n_rows_pad, LANE), jnp.float32),
        grid=(n_rows_pad // r_tile,),
        in_specs=[pl.BlockSpec((4, r_tile, LANE), lambda i: (0, i, 0))],
        out_specs=pl.BlockSpec((D_OUT, r_tile, LANE), lambda i: (0, i, 0)),
        compiler_params=pltpu.CompilerParams(dimension_semantics=("parallel",)),
    )(inp)

    # back to PyTorch edge-major (N, D_OUT); fused by XLA within this jit.
    return out.reshape(D_OUT, n_pad)[:, :n].T


# ------------------------------ reference (numpy) -----------------------------
def reference(direction, length):
    direction = np.asarray(direction, np.float64)
    length = np.asarray(length, np.float64)
    u = direction / np.linalg.norm(direction, axis=1, keepdims=True)
    ux, uy, uz = u[:, 0], u[:, 1], u[:, 2]
    sh = {
        0: np.ones((len(length), 1)),
        1: SQRT3 * np.stack([ux, uy, uz], axis=1),
        2: SQRT5 * np.stack([
            SQRT3 * ux * uz,
            SQRT3 * ux * uy,
            uy ** 2 - 0.5 * (ux ** 2 + uz ** 2),
            SQRT3 * uy * uz,
            0.5 * SQRT3 * (uz ** 2 - ux ** 2)], axis=1),
    }
    t = (length + EPS) / RCUT
    xc = length / RCUT
    p = 6.0
    cut = (1.0 - (p + 1) * (p + 2) / 2 * xc ** 6
           + p * (p + 2) * xc ** 7 - p * (p + 1) / 2 * xc ** 8) * (xc < 1.0)
    blocks = []
    for mul, l in TARGET_IRREPS:
        for f in range(mul):
            w = NORMS[l][f] * _sph_jn_np(l, ZEROS[l][f] * t)
            blocks.append(sh[l] * w[:, None])
    return np.concatenate(blocks, axis=1) * cut[:, None]


if __name__ == "__main__":
    key = jax.random.PRNGKey(0)
    k1, k2 = jax.random.split(key)
    n = 8
    direction = jax.random.normal(k1, (n, 3), dtype=jnp.float32)
    length = jax.random.uniform(k2, (n,), dtype=jnp.float32, minval=0.5, maxval=RCUT + 1.0)

    out = jax.block_until_ready(spherical_basis(direction, length))
    assert out.shape == (n, D_OUT), out.shape

    ref = reference(np.asarray(direction), np.asarray(length))
    np.testing.assert_allclose(np.asarray(out), ref, rtol=1e-4, atol=1e-4)
    print("KERNEL_OK")
</pallas_src>

<mosaic_0001>
module attributes {stable_mosaic.version = 11 : i64} {
  func.func @kernel(%arg0: i32, %arg1: memref<4x8x128xf32, #tpu.memory_space<vmem>>, %arg2: memref<18x8x128xf32, #tpu.memory_space<vmem>>) attributes {dimension_semantics = [#tpu.dimension_semantics<parallel>], iteration_bounds = array<i64: 1>, scalar_prefetch = 0 : i64, scratch_operands = 0 : i64, tpu.core_type = #tpu.core_type<tc>, window_params = [{transform_indices = @transform_0, window_bounds = array<i64: 4, 8, 128>}, {transform_indices = @transform_1, window_bounds = array<i64: 18, 8, 128>}]} {
    %c0 = arith.constant 0 : index
    %c0_0 = arith.constant 0 : index
    %c0_1 = arith.constant 0 : index
    %0 = vector.load %arg1[%c0, %c0_0, %c0_1] : memref<4x8x128xf32, #tpu.memory_space<vmem>>, vector<1x8x128xf32>
    %1 = vector.shape_cast %0 : vector<1x8x128xf32> to vector<8x128xf32>
    %c1 = arith.constant 1 : index
    %c0_2 = arith.constant 0 : index
    %c0_3 = arith.constant 0 : index
    %2 = vector.load %arg1[%c1, %c0_2, %c0_3] : memref<4x8x128xf32, #tpu.memory_space<vmem>>, vector<1x8x128xf32>
    %3 = vector.shape_cast %2 : vector<1x8x128xf32> to vector<8x128xf32>
    %c2 = arith.constant 2 : index
    %c0_4 = arith.constant 0 : index
    %c0_5 = arith.constant 0 : index
    %4 = vector.load %arg1[%c2, %c0_4, %c0_5] : memref<4x8x128xf32, #tpu.memory_space<vmem>>, vector<1x8x128xf32>
    %5 = vector.shape_cast %4 : vector<1x8x128xf32> to vector<8x128xf32>
    %c3 = arith.constant 3 : index
    %c0_6 = arith.constant 0 : index
    %c0_7 = arith.constant 0 : index
    %6 = vector.load %arg1[%c3, %c0_6, %c0_7] : memref<4x8x128xf32, #tpu.memory_space<vmem>>, vector<1x8x128xf32>
    %7 = vector.shape_cast %6 : vector<1x8x128xf32> to vector<8x128xf32>
    %8 = arith.mulf %1, %1 : vector<8x128xf32>
    %9 = arith.mulf %3, %3 : vector<8x128xf32>
    %10 = arith.addf %8, %9 : vector<8x128xf32>
    %11 = arith.mulf %5, %5 : vector<8x128xf32>
    %12 = arith.addf %10, %11 : vector<8x128xf32>
    %13 = math.rsqrt %12 : vector<8x128xf32>
    %14 = arith.mulf %1, %13 : vector<8x128xf32>
    %15 = arith.mulf %3, %13 : vector<8x128xf32>
    %16 = arith.mulf %5, %13 : vector<8x128xf32>
    %cst = arith.constant 2.000000e-01 : f32
    %17 = vector.broadcast %cst : f32 to vector<8x128xf32>
    %18 = arith.mulf %7, %17 : vector<8x128xf32>
    %cst_8 = arith.constant 2.000000e-08 : f32
    %19 = vector.broadcast %cst_8 : f32 to vector<8x128xf32>
    %20 = arith.addf %18, %19 : vector<8x128xf32>
    %cst_9 = arith.constant 1.000000e+00 : f32
    %21 = vector.broadcast %cst_9 : f32 to vector<8x128xf32>
    %22 = arith.divf %21, %20 : vector<8x128xf32>
    %23 = arith.mulf %18, %18 : vector<8x128xf32>
    %24 = arith.mulf %23, %18 : vector<8x128xf32>
    %25 = arith.mulf %24, %24 : vector<8x128xf32>
    %cst_10 = arith.constant 2.100000e+01 : f32
    %26 = vector.broadcast %cst_10 : f32 to vector<8x128xf32>
    %27 = arith.mulf %26, %18 : vector<8x128xf32>
    %cst_11 = arith.constant 4.800000e+01 : f32
    %28 = vector.broadcast %cst_11 : f32 to vector<8x128xf32>
    %29 = arith.subf %28, %27 : vector<8x128xf32>
    %30 = arith.mulf %18, %29 : vector<8x128xf32>
    %cst_12 = arith.constant -2.800000e+01 : f32
    %31 = vector.broadcast %cst_12 : f32 to vector<8x128xf32>
    %32 = arith.addf %31, %30 : vector<8x128xf32>
    %33 = arith.mulf %25, %32 : vector<8x128xf32>
    %cst_13 = arith.constant 1.000000e+00 : f32
    %34 = vector.broadcast %cst_13 : f32 to vector<8x128xf32>
    %35 = arith.addf %34, %33 : vector<8x128xf32>
    %cst_14 = arith.constant 1.000000e+00 : f32
    %36 = vector.broadcast %cst_14 : f32 to vector<8x128xf32>
    %37 = arith.cmpf olt, %18, %36 : vector<8x128xf32>
    %cst_15 = arith.constant 0.000000e+00 : f32
    %38 = vector.broadcast %cst_15 : f32 to vector<8x128xf32>
    %39 = arith.select %37, %35, %38 : vector<8x128xi1>, vector<8x128xf32>
    %cst_16 = arith.constant 3.14159274 : f32
    %40 = vector.broadcast %cst_16 : f32 to vector<8x128xf32>
    %41 = arith.mulf %40, %20 : vector<8x128xf32>
    %cst_17 = arith.constant 0.318309873 : f32
    %42 = vector.broadcast %cst_17 : f32 to vector<8x128xf32>
    %43 = arith.mulf %42, %22 : vector<8x128xf32>
    %44 = math.sin %41 : vector<8x128xf32>
    %45 = arith.mulf %44, %43 : vector<8x128xf32>
    %cst_18 = arith.constant 4.44288301 : f32
    %46 = vector.broadcast %cst_18 : f32 to vector<8x128xf32>
    %47 = arith.mulf %46, %45 : vector<8x128xf32>
    %48 = arith.mulf %47, %39 : vector<8x128xf32>
    %c0_19 = arith.constant 0 : index
    %c0_20 = arith.constant 0 : index
    %c0_21 = arith.constant 0 : index
    %49 = vector.load %arg2[%c0_19, %c0_20, %c0_21] : memref<18x8x128xf32, #tpu.memory_space<vmem>>, vector<1x8x128xf32>
    %50 = vector.shape_cast %49 : vector<1x8x128xf32> to vector<8x128xf32>
    %51 = vector.shape_cast %48 : vector<8x128xf32> to vector<1x8x128xf32>
    tpu.vector_store %arg2[%c0_19, %c0_20, %c0_21], %51 {strides = array<i32>} : memref<18x8x128xf32, #tpu.memory_space<vmem>>, vector<1x8x128xf32>,
    %cst_22 = arith.constant 6.28318548 : f32
    %52 = vector.broadcast %cst_22 : f32 to vector<8x128xf32>
    %53 = arith.mulf %52, %20 : vector<8x128xf32>
    %cst_23 = arith.constant 0.159154937 : f32
    %54 = vector.broadcast %cst_23 : f32 to vector<8x128xf32>
    %55 = arith.mulf %54, %22 : vector<8x128xf32>
    %56 = math.sin %53 : vector<8x128xf32>
    %57 = arith.mulf %56, %55 : vector<8x128xf32>
    %cst_24 = arith.constant 8.88576602 : f32
    %58 = vector.broadcast %cst_24 : f32 to vector<8x128xf32>
    %59 = arith.mulf %58, %57 : vector<8x128xf32>
    %60 = arith.mulf %59, %39 : vector<8x128xf32>
    %c1_25 = arith.constant 1 : index
    %c0_26 = arith.constant 0 : index
    %c0_27 = arith.constant 0 : index
    %61 = vector.load %arg2[%c1_25, %c0_26, %c0_27] : memref<18x8x128xf32, #tpu.memory_space<vmem>>, vector<1x8x128xf32>
    %62 = vector.shape_cast %61 : vector<1x8x128xf32> to vector<8x128xf32>
    %63 = vector.shape_cast %60 : vector<8x128xf32> to vector<1x8x128xf32>
    tpu.vector_store %arg2[%c1_25, %c0_26, %c0_27], %63 {strides = array<i32>} : memref<18x8x128xf32, #tpu.memory_space<vmem>>, vector<1x8x128xf32>,
    %cst_28 = arith.constant 1.73205078 : f32
    %64 = vector.broadcast %cst_28 : f32 to vector<8x128xf32>
    %65 = arith.mulf %64, %14 : vector<8x128xf32>
    %cst_29 = arith.constant 1.73205078 : f32
    %66 = vector.broadcast %cst_29 : f32 to vector<8x128xf32>
    %67 = arith.mulf %66, %15 : vector<8x128xf32>
    %cst_30 = arith.constant 1.73205078 : f32
    %68 = vector.broadcast %cst_30 : f32 to vector<8x128xf32>
    %69 = arith.mulf %68, %16 : vector<8x128xf32>
    %cst_31 = arith.constant 4.49340963 : f32
    %70 = vector.broadcast %cst_31 : f32 to vector<8x128xf32>
    %71 = arith.mulf %70, %20 : vector<8x128xf32>
    %cst_32 = arith.constant 0.222548157 : f32
    %72 = vector.broadcast %cst_32 : f32 to vector<8x128xf32>
    %73 = arith.mulf %72, %22 : vector<8x128xf32>
    %74 = math.sin %71 : vector<8x128xf32>
    %75 = math.cos %71 : vector<8x128xf32>
    %76 = arith.mulf %74, %73 : vector<8x128xf32>
    %77 = arith.subf %76, %75 : vector<8x128xf32>
    %78 = arith.mulf %73, %77 : vector<8x128xf32>
    %cst_33 = arith.constant 6.51010417 : f32
    %79 = vector.broadcast %cst_33 : f32 to vector<8x128xf32>
    %80 = arith.mulf %79, %78 : vector<8x128xf32>
    %81 = arith.mulf %80, %39 : vector<8x128xf32>
    %82 = arith.mulf %65, %81 : vector<8x128xf32>
    %c2_34 = arith.constant 2 : index
    %c0_35 = arith.constant 0 : index
    %c0_36 = arith.constant 0 : index
    %83 = vector.load %arg2[%c2_34, %c0_35, %c0_36] : memref<18x8x128xf32, #tpu.memory_space<vmem>>, vector<1x8x128xf32>
    %84 = vector.shape_cast %83 : vector<1x8x128xf32> to vector<8x128xf32>
    %85 = vector.shape_cast %82 : vector<8x128xf32> to vector<1x8x128xf32>
    tpu.vector_store %arg2[%c2_34, %c0_35, %c0_36], %85 {strides = array<i32>} : memref<18x8x128xf32, #tpu.memory_space<vmem>>, vector<1x8x128xf32>,
    %86 = arith.mulf %67, %81 : vector<8x128xf32>
    %c3_37 = arith.constant 3 : index
    %c0_38 = arith.constant 0 : index
    %c0_39 = arith.constant 0 : index
    %87 = vector.load %arg2[%c3_37, %c0_38, %c0_39] : memref<18x8x128xf32, #tpu.memory_space<vmem>>, vector<1x8x128xf32>
    %88 = vector.shape_cast %87 : vector<1x8x128xf32> to vector<8x128xf32>
    %89 = vector.shape_cast %86 : vector<8x128xf32> to vector<1x8x128xf32>
    tpu.vector_store %arg2[%c3_37, %c0_38, %c0_39], %89 {strides = array<i32>} : memref<18x8x128xf32, #tpu.memory_space<vmem>>, vector<1x8x128xf32>,
    %90 = arith.mulf %69, %81 : vector<8x128xf32>
    %c4 = arith.constant 4 : index
    %c0_40 = arith.constant 0 : index
    %c0_41 = arith.constant 0 : index
    %91 = vector.load %arg2[%c4, %c0_40, %c0_41] : memref<18x8x128xf32, #tpu.memory_space<vmem>>, vector<1x8x128xf32>
    %92 = vector.shape_cast %91 : vector<1x8x128xf32> to vector<8x128xf32>
    %93 = vector.shape_cast %90 : vector<8x128xf32> to vector<1x8x128xf32>
    tpu.vector_store %arg2[%c4, %c0_40, %c0_41], %93 {strides = array<i32>} : memref<18x8x128xf32, #tpu.memory_space<vmem>>, vector<1x8x128xf32>,
    %cst_42 = arith.constant 7.72525167 : f32
    %94 = vector.broadcast %cst_42 : f32 to vector<8x128xf32>
    %95 = arith.mulf %94, %20 : vector<8x128xf32>
    %cst_43 = arith.constant 0.129445612 : f32
    %96 = vector.broadcast %cst_43 : f32 to vector<8x128xf32>
    %97 = arith.mulf %96, %22 : vector<8x128xf32>
    %98 = math.sin %95 : vector<8x128xf32>
    %99 = math.cos %95 : vector<8x128xf32>
    %100 = arith.mulf %98, %97 : vector<8x128xf32>
    %101 = arith.subf %100, %99 : vector<8x128xf32>
    %102 = arith.mulf %97, %101 : vector<8x128xf32>
    %cst_44 = arith.constant 11.0163078 : f32
    %103 = vector.broadcast %cst_44 : f32 to vector<8x128xf32>
    %104 = arith.mulf %103, %102 : vector<8x128xf32>
    %105 = arith.mulf %104, %39 : vector<8x128xf32>
    %106 = arith.mulf %65, %105 : vector<8x128xf32>
    %c5 = arith.constant 5 : index
    %c0_45 = arith.constant 0 : index
    %c0_46 = arith.constant 0 : index
    %107 = vector.load %arg2[%c5, %c0_45, %c0_46] : memref<18x8x128xf32, #tpu.memory_space<vmem>>, vector<1x8x128xf32>
    %108 = vector.shape_cast %107 : vector<1x8x128xf32> to vector<8x128xf32>
    %109 = vector.shape_cast %106 : vector<8x128xf32> to vector<1x8x128xf32>
    tpu.vector_store %arg2[%c5, %c0_45, %c0_46], %109 {strides = array<i32>} : memref<18x8x128xf32, #tpu.memory_space<vmem>>, vector<1x8x128xf32>,
    %110 = arith.mulf %67, %105 : vector<8x128xf32>
    %c6 = arith.constant 6 : index
    %c0_47 = arith.constant 0 : index
    %c0_48 = arith.constant 0 : index
    %111 = vector.load %arg2[%c6, %c0_47, %c0_48] : memref<18x8x128xf32, #tpu.memory_space<vmem>>, vector<1x8x128xf32>
    %112 = vector.shape_cast %111 : vector<1x8x128xf32> to vector<8x128xf32>
    %113 = vector.shape_cast %110 : vector<8x128xf32> to vector<1x8x128xf32>
    tpu.vector_store %arg2[%c6, %c0_47, %c0_48], %113 {strides = array<i32>} : memref<18x8x128xf32, #tpu.memory_space<vmem>>, vector<1x8x128xf32>,
    %114 = arith.mulf %69, %105 : vector<8x128xf32>
    %c7 = arith.constant 7 : index
    %c0_49 = arith.constant 0 : index
    %c0_50 = arith.constant 0 : index
    %115 = vector.load %arg2[%c7, %c0_49, %c0_50] : memref<18x8x128xf32, #tpu.memory_space<vmem>>, vector<1x8x128xf32>
    %116 = vector.shape_cast %115 : vector<1x8x128xf32> to vector<8x128xf32>
    %117 = vector.shape_cast %114 : vector<8x128xf32> to vector<1x8x128xf32>
    tpu.vector_store %arg2[%c7, %c0_49, %c0_50], %117 {strides = array<i32>} : memref<18x8x128xf32, #tpu.memory_space<vmem>>, vector<1x8x128xf32>,
    %118 = arith.mulf %14, %14 : vector<8x128xf32>
    %119 = arith.mulf %15, %15 : vector<8x128xf32>
    %120 = arith.mulf %16, %16 : vector<8x128xf32>
    %121 = arith.mulf %14, %16 : vector<8x128xf32>
    %cst_51 = arith.constant 3.87298346 : f32
    %122 = vector.broadcast %cst_51 : f32 to vector<8x128xf32>
    %123 = arith.mulf %122, %121 : vector<8x128xf32>
    %124 = arith.mulf %14, %15 : vector<8x128xf32>
    %cst_52 = arith.constant 3.87298346 : f32
    %125 = vector.broadcast %cst_52 : f32 to vector<8x128xf32>
    %126 = arith.mulf %125, %124 : vector<8x128xf32>
    %127 = arith.addf %118, %120 : vector<8x128xf32>
    %cst_53 = arith.constant 5.000000e-01 : f32
    %128 = vector.broadcast %cst_53 : f32 to vector<8x128xf32>
    %129 = arith.mulf %128, %127 : vector<8x128xf32>
    %130 = arith.subf %119, %129 : vector<8x128xf32>
    %cst_54 = arith.constant 2.23606801 : f32
    %131 = vector.broadcast %cst_54 : f32 to vector<8x128xf32>
    %132 = arith.mulf %131, %130 : vector<8x128xf32>
    %133 = arith.mulf %15, %16 : vector<8x128xf32>
    %cst_55 = arith.constant 3.87298346 : f32
    %134 = vector.broadcast %cst_55 : f32 to vector<8x128xf32>
    %135 = arith.mulf %134, %133 : vector<8x128xf32>
    %136 = arith.subf %120, %118 : vector<8x128xf32>
    %cst_56 = arith.constant 1.93649173 : f32
    %137 = vector.broadcast %cst_56 : f32 to vector<8x128xf32>
    %138 = arith.mulf %137, %136 : vector<8x128xf32>
    %cst_57 = arith.constant 5.76345921 : f32
    %139 = vector.broadcast %cst_57 : f32 to vector<8x128xf32>
    %140 = arith.mulf %139, %20 : vector<8x128xf32>
    %cst_58 = arith.constant 0.173506916 : f32
    %141 = vector.broadcast %cst_58 : f32 to vector<8x128xf32>
    %142 = arith.mulf %141, %22 : vector<8x128xf32>
    %143 = math.sin %140 : vector<8x128xf32>
    %144 = math.cos %140 : vector<8x128xf32>
    %145 = arith.mulf %143, %142 : vector<8x128xf32>
    %cst_59 = arith.constant 3.000000e+00 : f32
    %146 = vector.broadcast %cst_59 : f32 to vector<8x128xf32>
    %147 = arith.mulf %146, %145 : vector<8x128xf32>
    %cst_60 = arith.constant 3.000000e+00 : f32
    %148 = vector.broadcast %cst_60 : f32 to vector<8x128xf32>
    %149 = arith.mulf %148, %144 : vector<8x128xf32>
    %150 = arith.subf %147, %149 : vector<8x128xf32>
    %151 = arith.mulf %142, %150 : vector<8x128xf32>
    %152 = arith.subf %151, %143 : vector<8x128xf32>
    %153 = arith.mulf %142, %152 : vector<8x128xf32>
    %cst_61 = arith.constant 8.5426464 : f32
    %154 = vector.broadcast %cst_61 : f32 to vector<8x128xf32>
    %155 = arith.mulf %154, %153 : vector<8x128xf32>
    %156 = arith.mulf %155, %39 : vector<8x128xf32>
    %157 = arith.mulf %123, %156 : vector<8x128xf32>
    %c8 = arith.constant 8 : index
    %c0_62 = arith.constant 0 : index
    %c0_63 = arith.constant 0 : index
    %158 = vector.load %arg2[%c8, %c0_62, %c0_63] : memref<18x8x128xf32, #tpu.memory_space<vmem>>, vector<1x8x128xf32>
    %159 = vector.shape_cast %158 : vector<1x8x128xf32> to vector<8x128xf32>
    %160 = vector.shape_cast %157 : vector<8x128xf32> to vector<1x8x128xf32>
    tpu.vector_store %arg2[%c8, %c0_62, %c0_63], %160 {strides = array<i32>} : memref<18x8x128xf32, #tpu.memory_space<vmem>>, vector<1x8x128xf32>,
    %161 = arith.mulf %126, %156 : vector<8x128xf32>
    %c9 = arith.constant 9 : index
    %c0_64 = arith.constant 0 : index
    %c0_65 = arith.constant 0 : index
    %162 = vector.load %arg2[%c9, %c0_64, %c0_65] : memref<18x8x128xf32, #tpu.memory_space<vmem>>, vector<1x8x128xf32>
    %163 = vector.shape_cast %162 : vector<1x8x128xf32> to vector<8x128xf32>
    %164 = vector.shape_cast %161 : vector<8x128xf32> to vector<1x8x128xf32>
    tpu.vector_store %arg2[%c9, %c0_64, %c0_65], %164 {strides = array<i32>} : memref<18x8x128xf32, #tpu.memory_space<vmem>>, vector<1x8x128xf32>,
    %165 = arith.mulf %132, %156 : vector<8x128xf32>
    %c10 = arith.constant 10 : index
    %c0_66 = arith.constant 0 : index
    %c0_67 = arith.constant 0 : index
    %166 = vector.load %arg2[%c10, %c0_66, %c0_67] : memref<18x8x128xf32, #tpu.memory_space<vmem>>, vector<1x8x128xf32>
    %167 = vector.shape_cast %166 : vector<1x8x128xf32> to vector<8x128xf32>
    %168 = vector.shape_cast %165 : vector<8x128xf32> to vector<1x8x128xf32>
    tpu.vector_store %arg2[%c10, %c0_66, %c0_67], %168 {strides = array<i32>} : memref<18x8x128xf32, #tpu.memory_space<vmem>>, vector<1x8x128xf32>,
    %169 = arith.mulf %135, %156 : vector<8x128xf32>
    %c11 = arith.constant 11 : index
    %c0_68 = arith.constant 0 : index
    %c0_69 = arith.constant 0 : index
    %170 = vector.load %arg2[%c11, %c0_68, %c0_69] : memref<18x8x128xf32, #tpu.memory_space<vmem>>, vector<1x8x128xf32>
    %171 = vector.shape_cast %170 : vector<1x8x128xf32> to vector<8x128xf32>
    %172 = vector.shape_cast %169 : vector<8x128xf32> to vector<1x8x128xf32>
    tpu.vector_store %arg2[%c11, %c0_68, %c0_69], %172 {strides = array<i32>} : memref<18x8x128xf32, #tpu.memory_space<vmem>>, vector<1x8x128xf32>,
    %173 = arith.mulf %138, %156 : vector<8x128xf32>
    %c12 = arith.constant 12 : index
    %c0_70 = arith.constant 0 : index
    %c0_71 = arith.constant 0 : index
    %174 = vector.load %arg2[%c12, %c0_70, %c0_71] : memref<18x8x128xf32, #tpu.memory_space<vmem>>, vector<1x8x128xf32>
    %175 = vector.shape_cast %174 : vector<1x8x128xf32> to vector<8x128xf32>
    %176 = vector.shape_cast %173 : vector<8x128xf32> to vector<1x8x128xf32>
    tpu.vector_store %arg2[%c12, %c0_70, %c0_71], %176 {strides = array<i32>} : memref<18x8x128xf32, #tpu.memory_space<vmem>>, vector<1x8x128xf32>,
    %cst_72 = arith.constant 9.09501171 : f32
    %177 = vector.broadcast %cst_72 : f32 to vector<8x128xf32>
    %178 = arith.mulf %177, %20 : vector<8x128xf32>
    %cst_73 = arith.constant 0.109950386 : f32
    %179 = vector.broadcast %cst_73 : f32 to vector<8x128xf32>
    %180 = arith.mulf %179, %22 : vector<8x128xf32>
    %181 = math.sin %178 : vector<8x128xf32>
    %182 = math.cos %178 : vector<8x128xf32>
    %183 = arith.mulf %181, %180 : vector<8x128xf32>
    %cst_74 = arith.constant 3.000000e+00 : f32
    %184 = vector.broadcast %cst_74 : f32 to vector<8x128xf32>
    %185 = arith.mulf %184, %183 : vector<8x128xf32>
    %cst_75 = arith.constant 3.000000e+00 : f32
    %186 = vector.broadcast %cst_75 : f32 to vector<8x128xf32>
    %187 = arith.mulf %186, %182 : vector<8x128xf32>
    %188 = arith.subf %185, %187 : vector<8x128xf32>
    %189 = arith.mulf %180, %188 : vector<8x128xf32>
    %190 = arith.subf %189, %181 : vector<8x128xf32>
    %191 = arith.mulf %180, %190 : vector<8x128xf32>
    %cst_76 = arith.constant 13.101758 : f32
    %192 = vector.broadcast %cst_76 : f32 to vector<8x128xf32>
    %193 = arith.mulf %192, %191 : vector<8x128xf32>
    %194 = arith.mulf %193, %39 : vector<8x128xf32>
    %195 = arith.mulf %123, %194 : vector<8x128xf32>
    %c13 = arith.constant 13 : index
    %c0_77 = arith.constant 0 : index
    %c0_78 = arith.constant 0 : index
    %196 = vector.load %arg2[%c13, %c0_77, %c0_78] : memref<18x8x128xf32, #tpu.memory_space<vmem>>, vector<1x8x128xf32>
    %197 = vector.shape_cast %196 : vector<1x8x128xf32> to vector<8x128xf32>
    %198 = vector.shape_cast %195 : vector<8x128xf32> to vector<1x8x128xf32>
    tpu.vector_store %arg2[%c13, %c0_77, %c0_78], %198 {strides = array<i32>} : memref<18x8x128xf32, #tpu.memory_space<vmem>>, vector<1x8x128xf32>,
    %199 = arith.mulf %126, %194 : vector<8x128xf32>
    %c14 = arith.constant 14 : index
    %c0_79 = arith.constant 0 : index
    %c0_80 = arith.constant 0 : index
    %200 = vector.load %arg2[%c14, %c0_79, %c0_80] : memref<18x8x128xf32, #tpu.memory_space<vmem>>, vector<1x8x128xf32>
    %201 = vector.shape_cast %200 : vector<1x8x128xf32> to vector<8x128xf32>
    %202 = vector.shape_cast %199 : vector<8x128xf32> to vector<1x8x128xf32>
    tpu.vector_store %arg2[%c14, %c0_79, %c0_80], %202 {strides = array<i32>} : memref<18x8x128xf32, #tpu.memory_space<vmem>>, vector<1x8x128xf32>,
    %203 = arith.mulf %132, %194 : vector<8x128xf32>
    %c15 = arith.constant 15 : index
    %c0_81 = arith.constant 0 : index
    %c0_82 = arith.constant 0 : index
    %204 = vector.load %arg2[%c15, %c0_81, %c0_82] : memref<18x8x128xf32, #tpu.memory_space<vmem>>, vector<1x8x128xf32>
    %205 = vector.shape_cast %204 : vector<1x8x128xf32> to vector<8x128xf32>
    %206 = vector.shape_cast %203 : vector<8x128xf32> to vector<1x8x128xf32>
    tpu.vector_store %arg2[%c15, %c0_81, %c0_82], %206 {strides = array<i32>} : memref<18x8x128xf32, #tpu.memory_space<vmem>>, vector<1x8x128xf32>,
    %207 = arith.mulf %135, %194 : vector<8x128xf32>
    %c16 = arith.constant 16 : index
    %c0_83 = arith.constant 0 : index
    %c0_84 = arith.constant 0 : index
    %208 = vector.load %arg2[%c16, %c0_83, %c0_84] : memref<18x8x128xf32, #tpu.memory_space<vmem>>, vector<1x8x128xf32>
    %209 = vector.shape_cast %208 : vector<1x8x128xf32> to vector<8x128xf32>
    %210 = vector.shape_cast %207 : vector<8x128xf32> to vector<1x8x128xf32>
    tpu.vector_store %arg2[%c16, %c0_83, %c0_84], %210 {strides = array<i32>} : memref<18x8x128xf32, #tpu.memory_space<vmem>>, vector<1x8x128xf32>,
    %211 = arith.mulf %138, %194 : vector<8x128xf32>
    %c17 = arith.constant 17 : index
    %c0_85 = arith.constant 0 : index
    %c0_86 = arith.constant 0 : index
    %212 = vector.load %arg2[%c17, %c0_85, %c0_86] : memref<18x8x128xf32, #tpu.memory_space<vmem>>, vector<1x8x128xf32>
    %213 = vector.shape_cast %212 : vector<1x8x128xf32> to vector<8x128xf32>
    %214 = vector.shape_cast %211 : vector<8x128xf32> to vector<1x8x128xf32>
    tpu.vector_store %arg2[%c17, %c0_85, %c0_86], %214 {strides = array<i32>} : memref<18x8x128xf32, #tpu.memory_space<vmem>>, vector<1x8x128xf32>,
    return
  }
  func.func @transform_0(%arg0: i32) -> (i32, i32, i32) {
    %c0_i32 = arith.constant 0 : i32
    %c0_i32_0 = arith.constant 0 : i32
    %c0_i32_1 = arith.constant 0 : i32
    return %c0_i32, %arg0, %c0_i32_0 : i32, i32, i32
  }
  func.func @transform_1(%arg0: i32) -> (i32, i32, i32) {
    %c0_i32 = arith.constant 0 : i32
    %c0_i32_0 = arith.constant 0 : i32
    %c0_i32_1 = arith.constant 0 : i32
    return %c0_i32, %arg0, %c0_i32_0 : i32, i32, i32
  }
}

</mosaic_0001>

<bundles_post_ra>
// kernel: spherical_basis.1
= control target key start
LH: loop header
LB: loop body
LE: loop exit
PB: predicated region body
PF: predicated region fallthrough
CT: control target
= control target key end

     0   :  { %v1312_v45 = vmov 683565275   ;;  %v1313_v47 = vmov 2475754826   ;;  %v1314_v49 = vmov 2131351028   ;;  %s2074_s0 = inlined_call_operand.vmem [shape: f32[4,8,128], index: 0, kind: input, shape index: {}]   ;;  %s2075_s1 = inlined_call_operand.vmem [shape: f32[18,8,128], index: 1, kind: output, shape index: {}]  }
   0x1   :  { %v1196_v0 = vld [vmem:[%s2074_s0 + $0x18] sm:$0xff]  ;;  %v1336_v2 = vld [vmem:[%s2074_s0] sm:$0xff]  ;;  %v1341_v3 = vld [vmem:[%s2074_s0 + $0x8] sm:$0xff]  ;;  %v1315_v51 = vmov 2102212464  }
   0x2   :  { %v1331_v1 = vmul.f32 0.2, %v1196_v0  ;;  %v15_v6 = vmul.f32 %v1336_v2, %v1336_v2  ;;  %v16_v7 = vmul.f32 %v1341_v3, %v1341_v3  ;;  %v1359_v9 = vld [vmem:[%s2074_s0 + $0x10] sm:$0xff]  ;;  %v1316_v53 = vmov 920167782  }
   0x3   :  { %v18_v15 = vmul.f32 %v1359_v9, %v1359_v9  ;;  %v1317_v61 = vmov 1326507024  }
   0x4   :  { %v1344_v4 = vadd.f32 2e-08, %v1331_v1  ;;  %v17_v14 = vadd.f32 %v16_v7, %v15_v6  ;;  %v28_v21 = vmul.f32 %v1331_v1, %v1331_v1  ;;  %v1377_v22 = vmul.f32 21.0, %v1331_v1 }
   0x6   :  { %v1347_v5 = vmul.f32 3.1415927, %v1344_v4  ;;  %v1354_v8 = vmul.f32 6.2831855, %v1344_v4  ;;  %v1368_v16 = vmul.f32 4.4934096, %v1344_v4  ;;  %v19_v25 = vadd.f32 %v18_v15, %v17_v14 }
   0x7   :  { %v1381_v32 = vmul.f32 %v28_v21, %v1331_v1  ;;  %v32_v33 = vsub.f32 48.0, %v1377_v22 }
   0x8   :  { %v41_v10 = vand.u32 2147483647, %v1347_v5  ;;  %v44_v11 = vand.u32 2139095040, %v1347_v5  ;;  %v151_v12 = vand.u32 2147483647, %v1354_v8  ;;  %v154_v13 = vand.u32 2139095040, %v1354_v8 }
   0x9   :  { %v268_v26 = vand.u32 2139095040, %v1368_v16  ;;  %1284 = vrsqrt.f32 %v19_v25  ;;  %v265_v39 = vand.u32 2147483647, %v1368_v16  ;;  %vm43_vm13 = vcmp.lt.s32.totalorder %v1347_v5, 0 }
   0xa   :  { %v45_v17 = vshrl.u32 %v44_v11, 23  ;;  %v48_v18 = vand.u32 8388607, %v41_v10  ;;  %v155_v19 = vshrl.u32 %v154_v13, 23  ;;  %v158_v20 = vand.u32 8388607, %v151_v12 }
   0xb   :  { %v269_v31 = vshrl.u32 %v268_v26, 23  ;;  %1286 = vrcp.f32 %v1344_v4  ;;  %vm1517_vm14 = vcmp.le.f32.partialorder %v41_v10, 0.7853982 }
   0xc   :  { %v1197_v23 = vadd.s32 4294967169, %v45_v17  ;;  %v1201_v24 = vadd.s32 4294967169, %v155_v19  ;;  %v49_v28 = vor.u32 8388608, %v48_v18  ;;  %v159_v29 = vor.u32 8388608, %v158_v20 }
   0xd   :  { %v1206_v35 = vadd.s32 4294967169, %v269_v31 }
   0xe   :  { %v51_v27 = vadd.s32 1, %v1197_v23  ;;  %v161_v30 = vadd.s32 1, %v1201_v24  ;;  %v1385_v40 = vshll.u32 %v49_v28, 8  ;;  %v1389_v43 = vshll.u32 %v159_v29, 8 }
   0xf   :  { %v1396_v55 = vadd.s32 1, %v1206_v35 }
  0x10   :  { %vm52_vm0 = vcmp.gt.s32.totalorder %v51_v27, 0  ;;  %vm162_vm1 = vcmp.gt.s32.totalorder %v161_v30, 0 }
  0x11   :  { %v53_v34 = vsel %vm52_vm0, %v51_v27, 0  ;;  %v163_v38 = vsel %vm162_vm1, %v161_v30, 0  ;;  %vm276_vm11 = vcmp.gt.s32.totalorder %v1396_v55, 0 }
  0x12   :  { %v54_v36 = vshrl.u32 %v53_v34, 5  ;;  %v55_v37 = vand.u32 31, %v53_v34  ;;  %v1387_v41 = vshrl.u32 %v163_v38, 5  ;;  %v165_v42 = vand.u32 31, %v163_v38 }
  0x13   :  { %v1409_v20 = vpop.eup %1284 }
  0x14   :  { %v56_v44 = vsub.s32 32, %v55_v37  ;;  %v58_v46 = vshll.u32 %v1312_v45, %v55_v37  ;;  %v61_v48 = vshll.u32 %v1313_v47, %v55_v37  ;;  %v64_v50 = vshll.u32 %v1314_v49, %v55_v37 }
  0x15   :  { %v67_v52 = vshll.u32 %v1315_v51, %v55_v37  ;;  %v70_v54 = vshll.u32 %v1316_v53, %v55_v37  ;;  %vm73_vm2 = vcmp.lt.s32.totalorder %v54_v36, 1  ;;  %vm74_vm3 = vcmp.lt.s32.totalorder %v54_v36, 2 }
  0x16   :  { %v57_v56 = vshrl.u32 %v1312_v45, %v56_v44  ;;  %v59_v57 = vshrl.u32 %v1313_v47, %v56_v44  ;;  %v62_v58 = vshrl.u32 %v1314_v49, %v56_v44  ;;  %v65_v59 = vshrl.u32 %v1315_v51, %v56_v44 }
  0x17   :  { %v68_v60 = vshrl.u32 %v1316_v53, %v56_v44  ;;  %v71_v62 = vshrl.u32 %v1317_v61, %v56_v44  ;;  %vm76_vm4 = vcmp.lt.s32.totalorder %v54_v36, 4  ;;  %v166_v7 = vsub.s32 32, %v165_v42 }
  0x18   :  { %v60_v63 = vor.u32 %v59_v57, %v58_v46  ;;  %v63_v0 = vor.u32 %v62_v58, %v61_v48  ;;  %v66_v6 = vor.u32 %v65_v59, %v64_v50  ;;  %vm75_vm5 = vcmp.lt.s32.totalorder %v54_v36, 3 }
  0x19   :  { %v69_v11 = vor.u32 %v68_v60, %v67_v52  ;;  %v72_v13 = vor.u32 %v71_v62, %v70_v54  ;;  %v168_v14 = vshll.u32 %v1312_v45, %v165_v42  ;;  %v171_v25 = vshll.u32 %v1313_v47, %v165_v42 }
  0x1a   :  { %v77_v15 = vsel %vm73_vm2, %v57_v56, %v60_v63  ;;  %v78_v17 = vsel %vm76_vm4, %v66_v6, 2102212464  ;;  %v81_v18 = vsel %vm73_vm2, %v60_v63, %v63_v0  ;;  %v85_v19 = vsel %vm73_vm2, %v63_v0, %v66_v6 }
  0x1b   :  { %v79_v21 = vsel %vm75_vm5, %v63_v0, %v78_v17  ;;  %v82_v23 = vsel %vm76_vm4, %v69_v11, 920167782  ;;  %v86_v24 = vsel %vm76_vm4, %v72_v13, 1326507024  ;;  %v167_v28 = vshrl.u32 %v1312_v45, %v166_v7 }
  0x1c   :  { %v83_v26 = vsel %vm75_vm5, %v66_v6, %v82_v23  ;;  %v87_v27 = vsel %vm75_vm5, %v69_v11, %v86_v24  ;;  %v169_v29 = vshrl.u32 %v1313_v47, %v166_v7  ;;  %v80_v30 = vsel %vm74_vm3, %v77_v15, %v79_v21 }
  0x1d   :  { %v84_v31 = vsel %vm74_vm3, %v81_v18, %v83_v26  ;;  %v88_v34 = vsel %vm74_vm3, %v85_v19, %v87_v27  ;;  %v172_v35 = vshrl.u32 %v1314_v49, %v166_v7  ;;  %v174_v52 = vshll.u32 %v1314_v49, %v165_v42 }
  0x1e   :  { %v1421_v37 = vmul.u32.u64.low %v1385_v40, %v88_v34  ;;  %v1422_v38 = vmul.u32.u64.high %v1385_v40, %v88_v34, %v1421_v37  ;;  %v1425_v44 = vmul.u32.u64.low %v1385_v40, %v84_v31  ;;  %v1426_v46 = vmul.u32.u64.high %v1385_v40, %v84_v31, %v1425_v44 }
  0x1f   :  { %v170_v48 = vor.u32 %v169_v29, %v168_v14  ;;  %v173_v50 = vor.u32 %v172_v35, %v171_v25  ;;  %v175_v54 = vshrl.u32 %v1315_v51, %v166_v7  ;;  %v177_v56 = vshll.u32 %v1315_v51, %v165_v42 }
  0x20   :  { %v178_v36 = vshrl.u32 %v1316_v53, %v166_v7  ;;  %v180_v57 = vshll.u32 %v1316_v53, %v165_v42  ;;  %v181_v58 = vshrl.u32 %v1317_v61, %v166_v7  ;;  %v96_v59 = vmul.u32 %v1385_v40, %v80_v30 }
  0x21   :  { %v176_v60 = vor.u32 %v175_v54, %v174_v52  ;;  %vm183_vm6 = vcmp.lt.s32.totalorder %v1387_v41, 1  ;;  %vm184_vm7 = vcmp.lt.s32.totalorder %v1387_v41, 2  ;;  %vm98_vm8 = vc.u32 %v1422_v38, %v1425_v44 }
  0x22   :  { %v99_v62 = vadd.s32 1, %v1426_v46  ;;  %v179_v63 = vor.u32 %v178_v36, %v177_v56  ;;  %vm185_vm9 = vcmp.lt.s32.totalorder %v1387_v41, 3  ;;  %v182_v0 = vor.u32 %v181_v58, %v180_v57 }
  0x23   :  { %vm186_vm10 = vcmp.lt.s32.totalorder %v1387_v41, 4  ;;  %v187_v42 = vsel %vm183_vm6, %v167_v28, %v170_v48  ;;  %v191_v6 = vsel %vm183_vm6, %v170_v48, %v173_v50  ;;  %v195_v13 = vsel %vm183_vm6, %v173_v50, %v176_v60 }
  0x24   :  { %v100_v7 = vsel %vm98_vm8, %v99_v62, %v1426_v46  ;;  %v188_v40 = vsel %vm186_vm10, %v176_v60, 2102212464  ;;  %v192_v11 = vsel %vm186_vm10, %v179_v63, 920167782  ;;  %v196_v18 = vsel %vm186_vm10, %v182_v0, 1326507024 }
  0x25   :  { %v101_v14 = vadd.s32 %v100_v7, %v96_v59  ;;  %v189_v15 = vsel %vm185_vm9, %v173_v50, %v188_v40  ;;  %v193_v17 = vsel %vm185_vm9, %v176_v60, %v192_v11  ;;  %v33_v19 = vmul.f32 %v32_v33, %v1331_v1 }
  0x26   :  { %v190_v21 = vsel %vm184_vm7, %v187_v42, %v189_v15  ;;  %v194_v23 = vsel %vm184_vm7, %v191_v6, %v193_v17  ;;  %v197_v24 = vsel %vm185_vm9, %v179_v63, %v196_v18  ;;  %v272_v29 = vand.u32 8388607, %v265_v39 }
  0x27   :  { %v102_v25 = vadd.s32 536870912, %v101_v14  ;;  %v198_v26 = vsel %vm184_vm7, %v195_v13, %v197_v24  ;;  %v1458_v27 = vmul.u32.u64.low %v1389_v43, %v194_v23  ;;  %v1459_v28 = vmul.u32.u64.high %v1389_v43, %v194_v23, %v1458_v27 }
  0x28   :  { %v1462_v22 = vmul.u32.u64.low %v1389_v43, %v198_v26  ;;  %v1463_v33 = vmul.u32.u64.high %v1389_v43, %v198_v26, %v1462_v22  ;;  %v206_v31 = vmul.u32 %v1389_v43, %v190_v21  ;;  %v277_v41 = vsel %vm276_vm11, %v1396_v55, 0 }
  0x29   :  { %v1467_v30 = vshrl.u32 %v102_v25, 30  ;;  %v30_v34 = vmul.f32 %v1381_v32, %v1381_v32  ;;  %v34_v35 = vadd.f32 -28.0, %v33_v19  ;;  %v209_v46 = vadd.s32 1, %v1459_v28 }
  0x2a   :  { %vm208_vm12 = vc.u32 %v1463_v33, %v1458_v27  ;;  %v273_v48 = vor.u32 8388608, %v272_v29  ;;  %v279_v50 = vand.u32 31, %v277_v41  ;;  %v1485_v36 = vmul.f32 7.7252517, %v1344_v4 }
  0x2b   :  { %v104_v37 = vshll.u32 %v1467_v30, 30  ;;  %v210_v54 = vsel %vm208_vm12, %v209_v46, %v1459_v28  ;;  %v1481_v55 = vmul.f32 %v34_v35, %v30_v34  ;;  %v97_v57 = vadd.s32 %v1425_v44, %v1422_v38 }
  0x2c   :  { %v211_v56 = vadd.s32 %v210_v54, %v206_v31  ;;  %v280_v43 = vsub.s32 32, %v279_v50  ;;  %v1490_v59 = vmul.f32 %v1409_v20, %v1336_v2  ;;  %v1492_v60 = vshll.u32 %v273_v48, 8 }
  0x2d   :  { %v1477_v52 = vsub.s32 %v101_v14, %v104_v37  ;;  %v1496_v63 = vshrl.u32 %v277_v41, 5  ;;  %v282_v0 = vshll.u32 %v1312_v45, %v279_v50  ;;  %v285_v42 = vshll.u32 %v1313_v47, %v279_v50 }
  0x2e   :  { %v212_v58 = vadd.s32 536870912, %v211_v56  ;;  %v283_v38 = vshrl.u32 %v1313_v47, %v280_v43  ;;  %v286_v44 = vshrl.u32 %v1314_v49, %v280_v43  ;;  %v288_v2 = vshll.u32 %v1314_v49, %v279_v50 }
  0x2f   :  { %v107_v32 = vsub.s32 0, %v1477_v52  ;;  %v289_v40 = vshrl.u32 %v1315_v51, %v280_v43  ;;  %v291_v11 = vshll.u32 %v1315_v51, %v279_v50  ;;  %v292_v13 = vshrl.u32 %v1316_v53, %v280_v43 }
  0x30   :  { %v1500_v6 = vshrl.u32 %v212_v58, 30  ;;  %v127_v14 = vsub.s32 4, %v1467_v30  ;;  %v1512_v17 = vmul.f32 %v1409_v20, %v1359_v9  ;;  %v491_v18 = vand.u32 2139095040, %v1485_v36 }
  0x31   :  { %v1198_v62 = vmin.u32 %v107_v32, %v1477_v52  ;;  %v207_v23 = vadd.s32 %v1458_v27, %v1463_v33  ;;  %v294_v24 = vshll.u32 %v1316_v53, %v279_v50  ;;  %v295_v25 = vshrl.u32 %v1317_v61, %v280_v43  ;;  %v1530_v27 = vpop.eup %1286 }
  0x32   :  { %v214_v15 = vshll.u32 %v1500_v6, 30  ;;  %v281_v9 = vshrl.u32 %v1312_v45, %v280_v43  ;;  %v284_v28 = vor.u32 %v283_v38, %v282_v0  ;;  %vm297_vm15 = vcmp.lt.s32.totalorder %v1496_v63, 1 }
  0x33   :  { %v109_v7 = vclz %v1198_v62  ;;  %v287_v22 = vor.u32 %v286_v44, %v285_v42  ;;  %v290_v10 = vor.u32 %v289_v40, %v288_v2  ;;  %v293_v29 = vor.u32 %v292_v13, %v291_v11 }
  0x34   :  { %v1524_v26 = vsub.s32 %v211_v56, %v214_v15  ;;  %v296_v34 = vor.u32 %v295_v25, %v294_v24  ;;  %vm300_vm1 = vcmp.lt.s32.totalorder %v1496_v63, 4  ;;  %v128_v48 = vsel %vm43_vm13, %v127_v14, %v1467_v30 }
  0x35   :  { %v1199_v21 = vadd.s32 4294967294, %v109_v7  ;;  %v302_v46 = vsel %vm300_vm1, %v290_v10, 2102212464  ;;  %vm153_vm2 = vcmp.lt.s32.totalorder %v1354_v8, 0  ;;  %vm298_vm3 = vcmp.lt.s32.totalorder %v1496_v63, 2 }
  0x36   :  { %v217_v41 = vsub.s32 0, %v1524_v26  ;;  %vm299_vm4 = vcmp.lt.s32.totalorder %v1496_v63, 3  ;;  %v306_v43 = vsel %vm300_vm1, %v293_v29, 920167782  ;;  %v301_v30 = vsel %vm297_vm15, %v281_v9, %v284_v28 }
  0x37   :  { %vm1200_vm0 = vcmp.lt.s32.totalorder %v1199_v21, 0  ;;  %v303_v58 = vsel %vm299_vm4, %v287_v22, %v302_v46  ;;  %v309_v62 = vsel %vm297_vm15, %v287_v22, %v290_v10  ;;  %vm1554_vm5 = vcmp.le.f32.partialorder %v151_v12, 0.7853982 }
  0x38   :  { %v112_v31 = vsel %vm1200_vm0, 0, %v1199_v21  ;;  %v1202_v50 = vmin.u32 %v217_v41, %v1524_v26  ;;  %v307_v38 = vsel %vm299_vm4, %v290_v10, %v306_v43  ;;  %v310_v44 = vsel %vm300_vm1, %v296_v34, 1326507024 }
  0x39   :  { %v113_v33 = vsub.s32 32, %v112_v31  ;;  %v114_v35 = vshll.u32 %v1477_v52, %v112_v31  ;;  %v117_v37 = vsub.s32 4294967266, %v112_v31  ;;  %v305_v52 = vsel %vm297_vm15, %v284_v28, %v287_v22 }
  0x3a   :  { %v219_v32 = vclz %v1202_v50  ;;  %v130_v2 = vsel %vm1517_vm14, 0, %v128_v48  ;;  %v308_v40 = vsel %vm298_vm3, %v305_v52, %v307_v38  ;;  %v311_v11 = vsel %vm299_vm4, %v293_v29, %v310_v44 }
  0x3b   :  { %v115_v54 = vshrl.u32 %v97_v57, %v113_v33  ;;  %v118_v56 = vadd.s32 127, %v117_v37  ;;  %v237_v14 = vsub.s32 4, %v1500_v6  ;;  %v312_v15 = vsel %vm298_vm3, %v309_v62, %v311_v11 }
  0x3c   :  { %v1203_v7 = vadd.s32 4294967294, %v219_v32  ;;  %v304_v21 = vsel %vm298_vm3, %v301_v30, %v303_v58  ;;  %v1574_v24 = vmul.u32.u64.low %v1492_v60, %v312_v15  ;;  %v1575_v25 = vmul.u32.u64.high %v1492_v60, %v312_v15, %v1574_v24 }
  0x3d   :  { %v116_v0 = vor.u32 %v115_v54, %v114_v35  ;;  %v119_v42 = vshll.u32 %v118_v56, 23  ;;  %v1578_v22 = vmul.u32.u64.low %v1492_v60, %v308_v40  ;;  %v1579_v10 = vmul.u32.u64.high %v1492_v60, %v308_v40, %v1578_v22 }
  0x3e   :  { %vm1204_vm6 = vcmp.lt.s32.totalorder %v1203_v7, 0  ;;  %v492_v34 = vshrl.u32 %v491_v18, 23  ;;  %v238_v63 = vsel %vm153_vm2, %v237_v14, %v1500_v6  ;;  %v488_v35 = vand.u32 2147483647, %v1485_v36 }
  0x3f   :  { %v120_v12 = vor.u32 4788187, %v119_v42  ;;  %v123_v13 = vcvt.s32.f32 %v116_v0  ;;  %v222_v28 = vsel %vm1204_vm6, 0, %v1203_v7  ;;  %v1588_v37 = vmul.f32 %v1512_v17, %v1490_v59 }
  0x40   :  { %v223_v29 = vsub.s32 32, %v222_v28  ;;  %v224_v31 = vshll.u32 %v1524_v26, %v222_v28  ;;  %v227_v41 = vsub.s32 4294967266, %v222_v28  ;;  %v320_v50 = vmul.u32 %v1492_v60, %v304_v21 }
  0x41   :  { %v121_v9 = vand.u32 2147483647, %v120_v12  ;;  %vm322_vm7 = vc.u32 %v1575_v25, %v1578_v22  ;;  %v134_v54 = vadd.s32 3, %v130_v2  ;;  %v323_v18 = vadd.s32 1, %v1579_v10 }
  0x42   :  { %v225_v46 = vshrl.u32 %v207_v23, %v223_v29  ;;  %v228_v48 = vadd.s32 127, %v227_v41  ;;  %v1217_v56 = vadd.s32 4294967169, %v492_v34  ;;  %v36_v52 = vadd.f32 1.0, %v1481_v55 }
  0x43   :  { %v124_v33 = vmul.f32 %v123_v13, %v121_v9  ;;  %v240_v32 = vsel %vm1554_vm5, 0, %v238_v63  ;;  %v324_v30 = vsel %vm322_vm7, %v323_v18, %v1579_v10  ;;  %v495_v60 = vand.u32 8388607, %v488_v35 }
  0x44   :  { %v226_v6 = vor.u32 %v225_v46, %v224_v31  ;;  %v229_v43 = vshll.u32 %v228_v48, 23  ;;  %v498_v58 = vadd.s32 1, %v1217_v56  ;;  %v325_v42 = vadd.s32 %v324_v30, %v320_v50 }
  0x45   :  { %v125_v26 = vxor.u32 2147483648, %v124_v33  ;;  %vm37_vm8 = vcmp.lt.f32.partialorder %v1331_v1, 1.0  ;;  %v1605_v38 = vand.u32 3, %v134_v54  ;;  %v244_v40 = vadd.s32 3, %v240_v32 }
  0x46   :  { %v230_v0 = vor.u32 4788187, %v229_v43  ;;  %v233_v55 = vcvt.s32.f32 %v226_v6  ;;  %vm499_vm9 = vcmp.gt.s32.totalorder %v498_v58, 0  ;;  %v326_v2 = vadd.s32 536870912, %v325_v42 }
  0x47   :  { %v126_v23 = vsel %vm43_vm13, %v125_v26, %v124_v33  ;;  %v500_v7 = vsel %vm499_vm9, %v498_v58, 0  ;;  %v496_v11 = vor.u32 8388608, %v495_v60  ;;  %v1607_v13 = vsel %vm37_vm8, %v36_v52, 0.0 }
  0x48   :  { %v129_v62 = vsel %vm1517_vm14, %v1347_v5, %v126_v23  ;;  %v231_v44 = vand.u32 2147483647, %v230_v0  ;;  %v502_v12 = vand.u32 31, %v500_v7  ;;  %v1610_v19 = vmul.f32 0.31830987, %v1530_v27 }
  0x49   :  { %1288 = vcosq.f32 %v129_v62  ;;  %v1612_v15 = vshrl.u32 %v326_v2, 30  ;;  %vm136_vm10 = vcmp.lt.s32.totalorder %v1605_v38, 2  ;;  %v1616_v1 = vmul.f32 0.15915494, %v1530_v27 }
  0x4a   :  { %1290 = vsinq.f32 %v129_v62  ;;  %v234_v14 = vmul.f32 %v233_v55, %v231_v44  ;;  %v1620_v21 = vmul.f32 %v1409_v20, %v1341_v3  ;;  %v503_v24 = vsub.s32 32, %v502_v12 }
  0x4b   :  { %vm133_vm11 = vweird.f32 %v1347_v5  ;;  %vm137_vm12 = vcmp.eq.s32.totalorder %v1605_v38, 0  ;;  %vm140_vm13 = vcmp.eq.s32.totalorder %v1605_v38, 2  ;;  %v328_v28 = vshll.u32 %v1612_v15, 30 }
  0x4c   :  { %v235_v9 = vxor.u32 2147483648, %v234_v14  ;;  %v1626_v10 = vand.u32 3, %v244_v40  ;;  %v1629_v29 = vadd.s32 %v1578_v22, %v1575_v25  ;;  %v1631_v31 = vshll.u32 %v496_v11, 8 }
  0x4d   :  { %v1634_v3 = vmul.f32 5.763459, %v1344_v4  ;;  %v1638_v41 = vsub.s32 %v325_v42, %v328_v28  ;;  %v1640_v34 = vshrl.u32 %v500_v7, 5  ;;  %v505_v33 = vshll.u32 %v1312_v45, %v502_v12 }
  0x4e   :  { %v236_v20 = vsel %vm153_vm2, %v235_v9, %v234_v14  ;;  %v506_v25 = vshrl.u32 %v1313_v47, %v503_v24  ;;  %v508_v22 = vshll.u32 %v1313_v47, %v502_v12  ;;  %v509_v46 = vshrl.u32 %v1314_v49, %v503_v24 }
  0x4f   :  { %v239_v63 = vsel %vm1554_vm5, %v1354_v8, %v236_v20  ;;  %v331_v48 = vsub.s32 0, %v1638_v41  ;;  %v514_v50 = vshll.u32 %v1315_v51, %v502_v12  ;;  %v515_v26 = vshrl.u32 %v1316_v53, %v503_v24 }
  0x50   :  { %1292 = vcosq.f32 %v239_v63  ;;  %v511_v18 = vshll.u32 %v1314_v49, %v502_v12  ;;  %v512_v57 = vshrl.u32 %v1315_v51, %v503_v24  ;;  %v517_v56 = vshll.u32 %v1316_v53, %v502_v12 }
  0x51   :  { %1294 = vsinq.f32 %v239_v63  ;;  %vm250_vm14 = vcmp.eq.s32.totalorder %v1626_v10, 2  ;;  %v1207_v43 = vmin.u32 %v331_v48, %v1638_v41  ;;  %v504_v32 = vshrl.u32 %v1312_v45, %v503_v24 }
  0x52   :  { %v729_v23 = vand.u32 2139095040, %v1634_v3  ;;  %vm247_vm15 = vcmp.eq.s32.totalorder %v1626_v10, 0  ;;  %v507_v60 = vor.u32 %v506_v25, %v505_v33  ;;  %v510_v58 = vor.u32 %v509_v46, %v508_v22 }
  0x53   :  { %v1289_v54 = vpop.eup %1288  ;;  %v518_v62 = vshrl.u32 %v1317_v61, %v503_v24  ;;  %vm246_vm0 = vcmp.lt.s32.totalorder %v1626_v10, 2  ;;  %v333_v55 = vclz %v1207_v43  ;;  %v351_v42 = vsub.s32 4, %v1612_v15 }
  0x54   :  { %v1291_v52 = vpop.eup %1290  ;;  %v141_v6 = vxor.u32 2147483648, %v1289_v54  ;;  %v516_v44 = vor.u32 %v515_v26, %v514_v50  ;;  %vm243_vm1 = vweird.f32 %v1354_v8  ;;  %v513_v7 = vor.u32 %v512_v57, %v511_v18 }
  0x55   :  { %v138_v30 = vxor.u32 2147483648, %v1291_v52  ;;  %v519_v40 = vor.u32 %v518_v62, %v517_v56  ;;  %vm520_vm2 = vcmp.lt.s32.totalorder %v1640_v34, 1  ;;  %vm267_vm3 = vcmp.lt.s32.totalorder %v1368_v16, 0 }
  0x56   :  { %v142_v0 = vsel %vm140_vm13, %v141_v6, %v1291_v52  ;;  %v1208_v12 = vadd.s32 4294967294, %v333_v55  ;;  %vm521_vm4 = vcmp.lt.s32.totalorder %v1640_v34, 2  ;;  %vm522_vm5 = vcmp.lt.s32.totalorder %v1640_v34, 3 }
  0x57   :  { %v139_v2 = vsel %vm137_vm12, %v1289_v54, %v138_v30  ;;  %vm523_vm6 = vcmp.lt.s32.totalorder %v1640_v34, 4  ;;  %v524_v24 = vsel %vm520_vm2, %v504_v32, %v507_v60  ;;  %v528_v9 = vsel %vm520_vm2, %v507_v60, %v510_v58 }
  0x58   :  { %v143_v11 = vsel %vm136_vm10, %v139_v2, %v142_v0  ;;  %vm1209_vm7 = vcmp.lt.s32.totalorder %v1208_v12, 0  ;;  %v525_v28 = vsel %vm523_vm6, %v513_v7, 2102212464  ;;  %v529_v20 = vsel %vm523_vm6, %v516_v44, 920167782 }
  0x59   :  { %v144_v14 = vsel %vm133_vm11, nan, %v143_v11  ;;  %vm1688_vm8 = vcmp.le.f32.partialorder %v265_v39, 0.7853982  ;;  %v336_v33 = vsel %vm1209_vm7, 0, %v1208_v12  ;;  %v526_v63 = vsel %vm522_vm5, %v510_v58, %v525_v28 }
  0x5a   :  { %v145_v38 = vmul.f32 %v144_v14, %v1610_v19  ;;  %v530_v19 = vsel %vm522_vm5, %v513_v7, %v529_v20  ;;  %v532_v25 = vsel %vm520_vm2, %v510_v58, %v513_v7  ;;  %v1293_v22 = vpop.eup %1292  ;;  %v337_v48 = vsub.s32 32, %v336_v33 }
  0x5b   :  { %v338_v50 = vshll.u32 %v1638_v41, %v336_v33  ;;  %v341_v26 = vsub.s32 4294967266, %v336_v33  ;;  %v1295_v39 = vpop.eup %1294  ;;  %v251_v54 = vxor.u32 2147483648, %v1293_v22  ;;  %v527_v18 = vsel %vm521_vm4, %v524_v24, %v526_v63 }
  0x5c   :  { %v146_v46 = vmul.f32 4.442883, %v145_v38  ;;  %v531_v57 = vsel %vm521_vm4, %v528_v9, %v530_v19  ;;  %v533_v56 = vsel %vm523_vm6, %v519_v40, 1326507024  ;;  %v248_v6 = vxor.u32 2147483648, %v1295_v39 }
  0x5d   :  { %v339_v43 = vshrl.u32 %v1629_v29, %v337_v48  ;;  %v342_v32 = vadd.s32 127, %v341_v26  ;;  %v252_v41 = vsel %vm250_vm14, %v251_v54, %v1295_v39  ;;  %v534_v30 = vsel %vm522_vm5, %v516_v44, %v533_v56 }
  0x5e   :  { %v147_v52 = vmul.f32 %v146_v46, %v1607_v13  ;;  %v1712_v60 = vmul.u32.u64.low %v1631_v31, %v531_v57  ;;  %v1713_v58 = vmul.u32.u64.high %v1631_v31, %v531_v57, %v1712_v60  ;;  %v249_v62 = vsel %vm247_vm15, %v1293_v22, %v248_v6 }
  0x5f   :  { %v340_v29 = vor.u32 %v339_v43, %v338_v50  ;;  %v343_v0 = vshll.u32 %v342_v32, 23  ;;  %v535_v55 = vsel %vm521_vm4, %v532_v25, %v534_v30  ;;  %v253_v44 = vsel %vm246_vm0, %v249_v62, %v252_v41 }
  0x60   :  { %148 = vst [vmem:[%s2075_s1] sm:$0xff] %v147_v52  ;;  %v352_v2 = vsel %vm267_vm3, %v351_v42, %v1612_v15  ;;  %v1729_v7 = vmul.u32.u64.low %v1631_v31, %v535_v55  ;;  %v1730_v40 = vmul.u32.u64.high %v1631_v31, %v535_v55, %v1729_v7  ;;  %v254_v11 = vsel %vm243_vm1, nan, %v253_v44 }
  0x61   :  { %v344_v12 = vor.u32 4788187, %v343_v0  ;;  %v347_v14 = vcvt.s32.f32 %v340_v29  ;;  %v730_v34 = vshrl.u32 %v729_v23, 23  ;;  %v255_v24 = vmul.f32 %v254_v11, %v1616_v1 }
  0x62   :  { %v543_v10 = vmul.u32 %v1631_v31, %v527_v18  ;;  %v546_v9 = vadd.s32 1, %v1713_v58  ;;  %v726_v15 = vand.u32 2147483647, %v1634_v3  ;;  %v354_v38 = vsel %vm1688_vm8, 0, %v352_v2 }
  0x63   :  { %v345_v42 = vand.u32 2147483647, %v344_v12  ;;  %v1228_v28 = vadd.s32 4294967169, %v730_v34  ;;  %v1744_v8 = vmul.f32 %v1620_v21, %v1490_v59  ;;  %v256_v20 = vmul.f32 8.885766, %v255_v24 }
  0x64   :  { %vm545_vm9 = vc.u32 %v1730_v40, %v1712_v60  ;;  %v358_v63 = vadd.s32 3, %v354_v38  ;;  %v733_v25 = vand.u32 8388607, %v726_v15  ;;  %v1754_v46 = vmul.f32 %v1512_v17, %v1620_v21 }
  0x65   :  { %v348_v1 = vmul.f32 %v347_v14, %v345_v42  ;;  %v547_v31 = vsel %vm545_vm9, %v546_v9, %v1713_v58  ;;  %v736_v23 = vadd.s32 1, %v1228_v28  ;;  %v257_v33 = vmul.f32 %v256_v20, %v1607_v13 }
  0x66   :  { %v548_v19 = vadd.s32 %v547_v31, %v543_v10  ;;  %v1760_v26 = vmul.f32 0.22254816, %v1530_v27  ;;  %v1764_v54 = vand.u32 3, %v354_v38  ;;  %v1769_v56 = vand.u32 3, %v358_v63 }
  0x67   :  { %v349_v22 = vxor.u32 2147483648, %v348_v1  ;;  %vm737_vm10 = vcmp.gt.s32.totalorder %v736_v23, 0  ;;  %1205 = vst [vmem:[%s2075_s1 + $0x8] sm:$0xff] %v257_v33  ;;  %v734_v6 = vor.u32 8388608, %v733_v25  ;;  %v1775_v32 = vmul.f32 %v1490_v59, %v1490_v59 }
  0x68   :  { %v549_v48 = vadd.s32 536870912, %v548_v19  ;;  %v738_v50 = vsel %vm737_vm10, %v736_v23, 0  ;;  %v1779_v41 = vmul.f32 %v1512_v17, %v1512_v17  ;;  %vm467_vm11 = vcmp.eq.s32.totalorder %v1764_v54, 2 }
  0x69   :  { %v350_v39 = vsel %vm267_vm3, %v349_v22, %v348_v1  ;;  %v740_v18 = vand.u32 31, %v738_v50  ;;  %v1782_v5 = vshrl.u32 %v738_v50, 5  ;;  %vm464_vm12 = vcmp.eq.s32.totalorder %v1764_v54, 0 }
  0x6a   :  { %v353_v57 = vsel %vm1688_vm8, %v1368_v16, %v350_v39  ;;  %v1771_v52 = vshrl.u32 %v549_v48, 30  ;;  %vm360_vm13 = vcmp.lt.s32.totalorder %v1769_v56, 2  ;;  %vm361_vm14 = vcmp.eq.s32.totalorder %v1769_v56, 0 }
  0x6b   :  { %1296 = vcosq.f32 %v353_v57  ;;  %v741_v43 = vsub.s32 32, %v740_v18  ;;  %v743_v58 = vshll.u32 %v1312_v45, %v740_v18  ;;  %v746_v29 = vshll.u32 %v1313_v47, %v740_v18 }
  0x6c   :  { %1298 = vsinq.f32 %v353_v57  ;;  %v551_v30 = vshll.u32 %v1771_v52, 30  ;;  %v749_v55 = vshll.u32 %v1314_v49, %v740_v18  ;;  %v752_v7 = vshll.u32 %v1315_v51, %v740_v18 }
  0x6d   :  { %v744_v62 = vshrl.u32 %v1313_v47, %v741_v43  ;;  %v747_v0 = vshrl.u32 %v1314_v49, %v741_v43  ;;  %v750_v2 = vshrl.u32 %v1315_v51, %v741_v43  ;;  %v753_v11 = vshrl.u32 %v1316_v53, %v741_v43 }
  0x6e   :  { %v1791_v44 = vsub.s32 %v548_v19, %v551_v30  ;;  %vm364_vm15 = vcmp.eq.s32.totalorder %v1769_v56, 2  ;;  %vm463_vm0 = vcmp.lt.s32.totalorder %v1764_v54, 2  ;;  %v544_v12 = vadd.s32 %v1712_v60, %v1730_v40 }
  0x6f   :  { %vm357_vm1 = vweird.f32 %v1368_v16  ;;  %v745_v34 = vor.u32 %v744_v62, %v743_v58  ;;  %v1804_v24 = vshll.u32 %v734_v6, 8  ;;  %v716_v10 = vadd.f32 %v1779_v41, %v1775_v32 }
  0x70   :  { %v554_v14 = vsub.s32 0, %v1791_v44  ;;  %v748_v9 = vor.u32 %v747_v0, %v746_v29  ;;  %v754_v42 = vor.u32 %v753_v11, %v752_v7  ;;  %v755_v38 = vshll.u32 %v1316_v53, %v740_v18 }
  0x71   :  { %v756_v28 = vshrl.u32 %v1317_v61, %v741_v43  ;;  %v742_v60 = vshrl.u32 %v1312_v45, %v741_v43  ;;  %v751_v40 = vor.u32 %v750_v2, %v749_v55  ;;  %vm758_vm2 = vcmp.lt.s32.totalorder %v1782_v5, 1 }
  0x72   :  { %v1218_v20 = vmin.u32 %v554_v14, %v1791_v44  ;;  %vm760_vm3 = vcmp.lt.s32.totalorder %v1782_v5, 3  ;;  %vm761_vm4 = vcmp.lt.s32.totalorder %v1782_v5, 4  ;;  %v1817_v1 = vmul.f32 %v1620_v21, %v1620_v21 }
  0x73   :  { %v1820_v31 = vmul.f32 9.095012, %v1344_v4  ;;  %v757_v33 = vor.u32 %v756_v28, %v755_v38  ;;  %vm759_vm5 = vcmp.lt.s32.totalorder %v1782_v5, 2  ;;  %v1823_v63 = vmul.f32 0.5, %v716_v10 }
  0x74   :  { %v556_v23 = vclz %v1218_v20  ;;  %v574_v25 = vsub.s32 4, %v1771_v52  ;;  %v763_v22 = vsel %vm761_vm4, %v751_v40, 2102212464  ;;  %v766_v48 = vsel %vm758_vm2, %v745_v34, %v748_v9 }
  0x75   :  { %v1297_v19 = vpop.eup %1296  ;;  %v767_v50 = vsel %vm761_vm4, %v754_v42, 920167782  ;;  %v762_v57 = vsel %vm758_vm2, %v742_v60, %v745_v34  ;;  %v764_v30 = vsel %vm760_vm3, %v748_v9, %v763_v22  ;;  %v770_v62 = vsel %vm758_vm2, %v748_v9, %v751_v40 }
  0x76   :  { %v1299_v4 = vpop.eup %1298  ;;  %v365_v39 = vxor.u32 2147483648, %v1297_v19  ;;  %v1219_v18 = vadd.s32 4294967294, %v556_v23  ;;  %v768_v6 = vsel %vm760_vm3, %v751_v40, %v767_v50  ;;  %v771_v55 = vsel %vm761_vm4, %v757_v33, 1326507024 }
  0x77   :  { %v362_v43 = vxor.u32 2147483648, %v1299_v4  ;;  %v769_v58 = vsel %vm759_vm5, %v766_v48, %v768_v6  ;;  %v772_v14 = vsel %vm760_vm3, %v754_v42, %v771_v55  ;;  %v718_v50 = vsub.f32 %v1817_v1, %v1823_v63 }
  0x78   :  { %v366_v29 = vsel %vm364_vm15, %v365_v39, %v1299_v4  ;;  %v469_v0 = vsel %vm467_vm11, %v365_v39, %v1299_v4  ;;  %vm1220_vm6 = vcmp.lt.s32.totalorder %v1219_v18, 0  ;;  %v773_v40 = vsel %vm759_vm5, %v770_v62, %v772_v14 }
  0x79   :  { %v363_v2 = vsel %vm361_vm14, %v1297_v19, %v362_v43  ;;  %v466_v7 = vsel %vm464_vm12, %v1297_v19, %v362_v43  ;;  %v559_v11 = vsel %vm1220_vm6, 0, %v1219_v18  ;;  %vm490_vm7 = vcmp.lt.s32.totalorder %v1485_v36, 0 }
  0x7a   :  { %v367_v34 = vsel %vm360_vm13, %v363_v2, %v366_v29  ;;  %v470_v10 = vsel %vm463_vm0, %v466_v7, %v469_v0  ;;  %v560_v9 = vsub.s32 32, %v559_v11  ;;  %v561_v38 = vshll.u32 %v1791_v44, %v559_v11 }
  0x7b   :  { %v368_v28 = vsel %vm357_vm1, nan, %v367_v34  ;;  %v471_v20 = vsel %vm357_vm1, nan, %v470_v10  ;;  %v564_v60 = vsub.s32 4294967266, %v559_v11  ;;  %v765_v44 = vsel %vm759_vm5, %v762_v57, %v764_v30 }
  0x7c   :  { %v472_v42 = vmul.f32 %v368_v28, %v1760_v26  ;;  %v562_v56 = vshrl.u32 %v544_v12, %v560_v9  ;;  %v1867_v23 = vmul.u32.u64.low %v1804_v24, %v773_v40  ;;  %v1868_v54 = vmul.u32.u64.high %v1804_v24, %v773_v40, %v1867_v23 }
  0x7d   :  { %v565_v33 = vadd.s32 127, %v564_v60  ;;  %v1873_v19 = vmul.u32.u64.low %v1804_v24, %v769_v58  ;;  %v1874_v22 = vmul.u32.u64.high %v1804_v24, %v769_v58, %v1873_v19  ;;  %v1880_v12 = vmul.f32 1.7320508, %v1490_v59 }
  0x7e   :  { %v473_v16 = vsub.f32 %v472_v42, %v471_v20  ;;  %v563_v48 = vor.u32 %v562_v56, %v561_v38  ;;  %v962_v39 = vand.u32 2139095040, %v1820_v31  ;;  %v575_v18 = vsel %vm490_vm7, %v574_v25, %v1771_v52 }
  0x7f   :  { %v566_v4 = vshll.u32 %v565_v33, 23  ;;  %v781_v57 = vmul.u32 %v1804_v24, %v765_v44  ;;  %vm783_vm8 = vc.u32 %v1868_v54, %v1873_v19  ;;  %v784_v59 = vadd.s32 1, %v1874_v22 }
  0x80   :  { %v474_v5 = vmul.f32 %v473_v16, %v1760_v26  ;;  %v570_v43 = vcvt.s32.f32 %v563_v48  ;;  %v963_v30 = vshrl.u32 %v962_v39, 23  ;;  %v1893_v62 = vmul.f32 1.7320508, %v1620_v21 }
  0x81   :  { %v567_v6 = vor.u32 4788187, %v566_v4  ;;  %v1896_v26 = vmul.f32 1.7320508, %v1512_v17  ;;  %vm1900_vm9 = vcmp.le.f32.partialorder %v488_v35, 0.7853982  ;;  %v785_v25 = vsel %vm783_vm8, %v784_v59, %v1874_v22 }
  0x82   :  { %v475_v58 = vmul.f32 6.510104, %v474_v5  ;;  %v1241_v29 = vadd.s32 4294967169, %v963_v30  ;;  %v577_v55 = vsel %vm1900_vm9, 0, %v575_v18  ;;  %v786_v21 = vadd.s32 %v785_v25, %v781_v57 }
  0x83   :  { %v568_v24 = vand.u32 2147483647, %v567_v6  ;;  %v581_v10 = vadd.s32 3, %v577_v55  ;;  %v959_v9 = vand.u32 2147483647, %v1820_v31  ;;  %v1928_v42 = vand.u32 3, %v577_v55 }
  0x84   :  { %v476_v0 = vmul.f32 %v475_v58, %v1607_v13  ;;  %v969_v7 = vadd.s32 1, %v1241_v29  ;;  %v787_v14 = vadd.s32 536870912, %v786_v21  ;;  %v1940_v4 = vmul.f32 0.12944561, %v1530_v27 }
  0x85   :  { %v571_v2 = vmul.f32 %v570_v43, %v568_v24  ;;  %v1931_v23 = vand.u32 3, %v581_v10  ;;  %v966_v33 = vand.u32 8388607, %v959_v9  ;;  %vm687_vm11 = vcmp.eq.s32.totalorder %v1928_v42, 0 }
  0x86   :  { %v477_v17 = vmul.f32 %v476_v0, %v1880_v12  ;;  %v480_v11 = vmul.f32 %v476_v0, %v1893_v62  ;;  %v483_v35 = vmul.f32 %v476_v0, %v1896_v26  ;;  %vm970_vm10 = vcmp.gt.s32.totalorder %v969_v7, 0 }
  0x87   :  { %v572_v34 = vxor.u32 2147483648, %v571_v2  ;;  %v1921_v38 = vshrl.u32 %v787_v14, 30  ;;  %v971_v28 = vsel %vm970_vm10, %v969_v7, 0  ;;  %vm690_vm12 = vcmp.eq.s32.totalorder %v1928_v42, 2 }
  0x88   :  { %1214 = vst [vmem:[%s2075_s1 + $0x10] sm:$0xff] %v477_v17  ;;  %1215 = vst [vmem:[%s2075_s1 + $0x18] sm:$0xff] %v480_v11  ;;  %v973_v60 = vand.u32 31, %v971_v28  ;;  %vm686_vm13 = vcmp.lt.s32.totalorder %v1928_v42, 2  ;;  %v967_v43 = vor.u32 8388608, %v966_v33  ;;  %v972_v59 = vshrl.u32 %v971_v28, 5 }
  0x89   :  { %1216 = vst [vmem:[%s2075_s1 + $0x20] sm:$0xff] %v483_v35  ;;  %v573_v20 = vsel %vm490_vm7, %v572_v34, %v571_v2  ;;  %v789_v56 = vshll.u32 %v1921_v38, 30  ;;  %vm580_vm14 = vweird.f32 %v1485_v36  ;;  %vm583_vm15 = vcmp.lt.s32.totalorder %v1931_v23, 2 }
  0x8a   :  { %v576_v40 = vsel %vm1900_vm9, %v1485_v36, %v573_v20  ;;  %v974_v44 = vsub.s32 32, %v973_v60  ;;  %v976_v16 = vshll.u32 %v1312_v45, %v973_v60  ;;  %v979_v48 = vshll.u32 %v1313_v47, %v973_v60 }
  0x8b   :  { %1300 = vcosq.f32 %v576_v40  ;;  %v1935_v22 = vsub.s32 %v786_v21, %v789_v56  ;;  %v982_v57 = vshll.u32 %v1314_v49, %v973_v60  ;;  %v985_v30 = vshll.u32 %v1315_v51, %v973_v60 }
  0x8c   :  { %1302 = vsinq.f32 %v576_v40  ;;  %v977_v39 = vshrl.u32 %v1313_v47, %v974_v44  ;;  %v980_v5 = vshrl.u32 %v1314_v49, %v974_v44  ;;  %v983_v6 = vshrl.u32 %v1315_v51, %v974_v44 }
  0x8d   :  { %v792_v18 = vsub.s32 0, %v1935_v22  ;;  %v986_v47 = vshrl.u32 %v1316_v53, %v974_v44  ;;  %vm584_vm0 = vcmp.eq.s32.totalorder %v1931_v23, 0  ;;  %v975_v49 = vshrl.u32 %v1312_v45, %v974_v44 }
  0x8e   :  { %v978_v52 = vor.u32 %v977_v39, %v976_v16  ;;  %v981_v24 = vor.u32 %v980_v5, %v979_v48  ;;  %v988_v29 = vshll.u32 %v1316_v53, %v973_v60  ;;  %vm587_vm1 = vcmp.eq.s32.totalorder %v1931_v23, 2 }
  0x8f   :  { %v1229_v58 = vmin.u32 %v792_v18, %v1935_v22  ;;  %v987_v25 = vor.u32 %v986_v47, %v985_v30  ;;  %v782_v51 = vadd.s32 %v1873_v19, %v1868_v54  ;;  %v984_v55 = vor.u32 %v983_v6, %v982_v57 }
  0x90   :  { %v989_v21 = vshrl.u32 %v1317_v61, %v974_v44  ;;  %vm991_vm2 = vcmp.lt.s32.totalorder %v972_v59, 1  ;;  %vm993_vm3 = vcmp.lt.s32.totalorder %v972_v59, 3  ;;  %v1007_v2 = vshll.u32 %v967_v43, 8 }
  0x91   :  { %v794_v0 = vclz %v1229_v58  ;;  %vm992_vm4 = vcmp.lt.s32.totalorder %v972_v59, 2  ;;  %vm994_vm5 = vcmp.lt.s32.totalorder %v972_v59, 4  ;;  %v999_v45 = vsel %vm991_vm2, %v978_v52, %v981_v24 }
  0x92   :  { %v990_v11 = vor.u32 %v989_v21, %v988_v29  ;;  %v995_v53 = vsel %vm991_vm2, %v975_v49, %v978_v52  ;;  %v996_v35 = vsel %vm994_vm5, %v984_v55, 2102212464  ;;  %v1000_v54 = vsel %vm994_vm5, %v987_v25, 920167782 }
  0x93   :  { %v1230_v7 = vadd.s32 4294967294, %v794_v0  ;;  %v1001_v61 = vsel %vm993_vm3, %v984_v55, %v1000_v54  ;;  %v1003_v34 = vsel %vm991_vm2, %v981_v24, %v984_v55  ;;  %v997_v20 = vsel %vm993_vm3, %v981_v24, %v996_v35 }
  0x94   :  { %v1002_v60 = vsel %vm992_vm4, %v999_v45, %v1001_v61  ;;  %v1004_v5 = vsel %vm994_vm5, %v990_v11, 1326507024  ;;  %v998_v29 = vsel %vm992_vm4, %v995_v53, %v997_v20  ;;  %vm728_vm8 = vcmp.lt.s32.totalorder %v1634_v3, 0 }
  0x95   :  { %v1301_v17 = vpop.eup %1300  ;;  %vm1231_vm6 = vcmp.lt.s32.totalorder %v1230_v7, 0  ;;  %v1005_v43 = vsel %vm993_vm3, %v987_v25, %v1004_v5  ;;  %vm727_vm9 = vcmp.le.f32.partialorder %v726_v15, 0.7853982  ;;  %vm961_vm2 = vcmp.lt.s32.totalorder %v1820_v31, 0 }
  0x96   :  { %v1303_v19 = vpop.eup %1302  ;;  %v588_v14 = vxor.u32 2147483648, %v1301_v17  ;;  %v797_v28 = vsel %vm1231_vm6, 0, %v1230_v7  ;;  %v1006_v58 = vsel %vm992_vm4, %v1003_v34, %v1005_v43  ;;  %v1014_v7 = vmul.u32 %v1007_v2, %v998_v29 }
  0x97   :  { %v585_v10 = vxor.u32 2147483648, %v1303_v19  ;;  %v798_v33 = vsub.s32 32, %v797_v28  ;;  %v799_v44 = vshll.u32 %v1935_v22, %v797_v28  ;;  %v802_v39 = vsub.s32 4294967266, %v797_v28 }
  0x98   :  { %v589_v40 = vsel %vm587_vm1, %v588_v14, %v1303_v19  ;;  %v692_v56 = vsel %vm690_vm12, %v588_v14, %v1303_v19  ;;  %v1991_v23 = vmul.u32.u64.low %v1007_v2, %v1006_v58  ;;  %v1992_v49 = vmul.u32.u64.high %v1007_v2, %v1006_v58, %v1991_v23 }
  0x99   :  { %v586_v16 = vsel %vm584_vm0, %v1301_v17, %v585_v10  ;;  %v689_v48 = vsel %vm687_vm11, %v1301_v17, %v585_v10  ;;  %v800_v6 = vshrl.u32 %v782_v51, %v798_v33  ;;  %v803_v47 = vadd.s32 127, %v802_v39 }
  0x9a   :  { %v590_v18 = vsel %vm583_vm15, %v586_v16, %v589_v40  ;;  %v693_v57 = vsel %vm686_vm13, %v689_v48, %v692_v56  ;;  %v1995_v51 = vmul.u32.u64.low %v1007_v2, %v1002_v60  ;;  %v1996_v25 = vmul.u32.u64.high %v1007_v2, %v1002_v60, %v1995_v51 }
  0x9b   :  { %v591_v22 = vsel %vm580_vm14, nan, %v590_v18  ;;  %v694_v30 = vsel %vm580_vm14, nan, %v693_v57  ;;  %v801_v24 = vor.u32 %v800_v6, %v799_v44  ;;  %v804_v42 = vshll.u32 %v803_v47, 23 }
  0x9c   :  { %v695_v52 = vmul.f32 %v591_v22, %v1940_v4  ;;  %vm1016_vm7 = vc.u32 %v1992_v49, %v1995_v51  ;;  %v812_v17 = vsub.s32 4, %v1921_v38  ;;  %v1017_v11 = vadd.s32 1, %v1996_v25 }
  0x9d   :  { %v805_v55 = vor.u32 4788187, %v804_v42  ;;  %v808_v21 = vcvt.s32.f32 %v801_v24  ;;  %v725_v48 = vmul.f32 0.17350692, %v1530_v27  ;;  %vm818_vm14 = vweird.f32 %v1634_v3 }
  0x9e   :  { %v696_v0 = vsub.f32 %v695_v52, %v694_v30  ;;  %v1018_v59 = vsel %vm1016_vm7, %v1017_v11, %v1996_v25  ;;  %v813_v2 = vsel %vm728_vm8, %v812_v17, %v1921_v38  ;;  %v1015_v22 = vadd.s32 %v1995_v51, %v1992_v49 }
  0x9f   :  { %v806_v45 = vand.u32 2147483647, %v805_v55  ;;  %v1019_v19 = vadd.s32 %v1018_v59, %v1014_v7  ;;  %vm960_vm3 = vcmp.le.f32.partialorder %v959_v9, 0.7853982 }
  0xa0   :  { %v697_v36 = vmul.f32 %v696_v0, %v1940_v4 }
  0xa1   :  { %v809_v54 = vmul.f32 %v808_v21, %v806_v45  ;;  %v1020_v10 = vadd.s32 536870912, %v1019_v19 }
  0xa2   :  { %v698_v35 = vmul.f32 11.016308, %v697_v36 }
  0xa3   :  { %v810_v4 = vxor.u32 2147483648, %v809_v54 }
  0xa4   :  { %v699_v53 = vmul.f32 %v698_v35, %v1607_v13 }
  0xa5   :  { %v811_v28 = vsel %vm728_vm8, %v810_v4, %v809_v54  ;;  %v722_v4 = vsub.f32 %v1779_v41, %v1775_v32  ;;  %v721_v32 = vmul.f32 3.8729835, %v1754_v46 }
  0xa6   :  { %v700_v14 = vmul.f32 %v699_v53, %v1880_v12  ;;  %v703_v61 = vmul.f32 %v699_v53, %v1893_v62  ;;  %v706_v34 = vmul.f32 %v699_v53, %v1896_v26  ;;  %v814_v15 = vsel %vm727_vm9, %v1634_v3, %v811_v28 }
  0xa7   :  { %v815_v12 = vsel %vm727_vm9, 0, %v813_v2  ;;  %v1021_v62 = vshrl.u32 %v1020_v10, 30  ;;  %1304 = vcosq.f32 %v814_v15  ;;  %v713_v2 = vmul.f32 3.8729835, %v1588_v37 }
  0xa8   :  { %1225 = vst [vmem:[%s2075_s1 + $0x28] sm:$0xff] %v700_v14  ;;  %1226 = vst [vmem:[%s2075_s1 + $0x30] sm:$0xff] %v703_v61  ;;  %1306 = vsinq.f32 %v814_v15  ;;  %v819_v38 = vadd.s32 3, %v815_v12  ;;  %v923_v56 = vand.u32 3, %v815_v12  ;;  %v715_v61 = vmul.f32 3.8729835, %v1744_v8 }
  0xa9   :  { %1227 = vst [vmem:[%s2075_s1 + $0x38] sm:$0xff] %v706_v34  ;;  %v1022_v26 = vshll.u32 %v1021_v62, 30  ;;  %v1045_v53 = vsub.s32 4, %v1021_v62  ;;  %v719_v15 = vmul.f32 2.236068, %v718_v50 }
  0xaa   :  { %v820_v40 = vand.u32 3, %v819_v38  ;;  %vm928_vm11 = vcmp.eq.s32.totalorder %v923_v56, 2  ;;  %vm925_vm13 = vcmp.eq.s32.totalorder %v923_v56, 0  ;;  %vm924_vm0 = vcmp.lt.s32.totalorder %v923_v56, 2 }
  0xab   :  { %v1023_v20 = vsub.s32 %v1019_v19, %v1022_v26  ;;  %v1046_v10 = vsel %vm961_vm2, %v1045_v53, %v1021_v62  ;;  %v723_v41 = vmul.f32 1.9364917, %v722_v4 }
  0xac   :  { %vm825_vm10 = vcmp.eq.s32.totalorder %v820_v40, 2  ;;  %vm822_vm12 = vcmp.eq.s32.totalorder %v820_v40, 0  ;;  %vm821_vm15 = vcmp.lt.s32.totalorder %v820_v40, 2  ;;  %v1048_v38 = vsel %vm960_vm3, 0, %v1046_v10 }
  0xad   :  { %v1025_v60 = vsub.s32 0, %v1023_v20  ;;  %v1052_v40 = vadd.s32 3, %v1048_v38  ;;  %v1156_v1 = vand.u32 3, %v1048_v38 }
  0xaf   :  { %v1242_v33 = vmin.u32 %v1025_v60, %v1023_v20  ;;  %v1053_v46 = vand.u32 3, %v1052_v40  ;;  %vm1161_vm5 = vcmp.eq.s32.totalorder %v1156_v1, 2  ;;  %vm1157_vm7 = vcmp.lt.s32.totalorder %v1156_v1, 2 }
  0xb0   :  { %vm1158_vm8 = vcmp.eq.s32.totalorder %v1156_v1, 0 }
  0xb1   :  { %v1027_v44 = vclz %v1242_v33  ;;  %v1305_v16 = vpop.eup %1304  ;;  %vm1058_vm4 = vcmp.eq.s32.totalorder %v1053_v46, 2  ;;  %vm1055_vm6 = vcmp.eq.s32.totalorder %v1053_v46, 0  ;;  %vm1054_vm9 = vcmp.lt.s32.totalorder %v1053_v46, 2 }
  0xb2   :  { %v1307_v39 = vpop.eup %1306  ;;  %v826_v5 = vxor.u32 2147483648, %v1305_v16 }
  0xb3   :  { %v1243_v18 = vadd.s32 4294967294, %v1027_v44  ;;  %v823_v57 = vxor.u32 2147483648, %v1307_v39 }
  0xb4   :  { %v827_v6 = vsel %vm825_vm10, %v826_v5, %v1307_v39  ;;  %v930_v43 = vsel %vm928_vm11, %v826_v5, %v1307_v39  ;;  %vm1051_vm10 = vweird.f32 %v1820_v31 }
  0xb5   :  { %vm1244_vm1 = vcmp.lt.s32.totalorder %v1243_v18, 0  ;;  %v824_v30 = vsel %vm822_vm12, %v1305_v16, %v823_v57  ;;  %v927_v47 = vsel %vm925_vm13, %v1305_v16, %v823_v57 }
  0xb6   :  { %v1030_v58 = vsel %vm1244_vm1, 0, %v1243_v18  ;;  %v828_v52 = vsel %vm821_vm15, %v824_v30, %v827_v6  ;;  %v931_v24 = vsel %vm924_vm0, %v927_v47, %v930_v43 }
  0xb7   :  { %v1031_v23 = vsub.s32 32, %v1030_v58  ;;  %v1032_v42 = vshll.u32 %v1023_v20, %v1030_v58  ;;  %v829_v29 = vsel %vm818_vm14, nan, %v828_v52  ;;  %v932_v25 = vsel %vm818_vm14, nan, %v931_v24 }
  0xb8   :  { %v1035_v0 = vsub.s32 4294967266, %v1030_v58  ;;  %v933_v55 = vmul.f32 %v829_v29, %v725_v48  ;;  %v935_v21 = vmul.f32 3.0, %v932_v25 }
  0xb9   :  { %v1033_v36 = vshrl.u32 %v1015_v22, %v1031_v23 }
  0xba   :  { %v1036_v7 = vadd.s32 127, %v1035_v0  ;;  %v934_v49 = vmul.f32 3.0, %v933_v55 }
  0xbb   :  { %v1034_v51 = vor.u32 %v1033_v36, %v1032_v42 }
  0xbc   :  { %v1037_v45 = vshll.u32 %v1036_v7, 23  ;;  %v936_v17 = vsub.f32 %v934_v49, %v935_v21 }
  0xbd   :  { %v1041_v35 = vcvt.s32.f32 %v1034_v51 }
  0xbe   :  { %v1038_v11 = vor.u32 4788187, %v1037_v45  ;;  %v937_v54 = vmul.f32 %v936_v17, %v725_v48 }
  0xc0   :  { %v1039_v59 = vand.u32 2147483647, %v1038_v11  ;;  %v938_v19 = vsub.f32 %v937_v54, %v829_v29 }
  0xc2   :  { %v1042_v3 = vmul.f32 %v1041_v35, %v1039_v59  ;;  %v939_v14 = vmul.f32 %v938_v19, %v725_v48  ;;  %v958_v48 = vmul.f32 0.109950386, %v1530_v27 }
  0xc4   :  { %v1043_v34 = vxor.u32 2147483648, %v1042_v3  ;;  %v940_v28 = vmul.f32 8.542646, %v939_v14 }
  0xc6   :  { %v1044_v12 = vsel %vm961_vm2, %v1043_v34, %v1042_v3  ;;  %v941_v37 = vmul.f32 %v940_v28, %v1607_v13 }
  0xc7   :  { %v1047_v26 = vsel %vm960_vm3, %v1820_v31, %v1044_v12 }
  0xc8   :  { %1308 = vcosq.f32 %v1047_v26  ;;  %v942_v8 = vmul.f32 %v941_v37, %v713_v2  ;;  %v945_v20 = vmul.f32 %v941_v37, %v715_v61  ;;  %v948_v9 = vmul.f32 %v941_v37, %v719_v15 }
  0xc9   :  { %v951_v60 = vmul.f32 %v941_v37, %v721_v32  ;;  %v954_v62 = vmul.f32 %v941_v37, %v723_v41  ;;  %1310 = vsinq.f32 %v1047_v26 }
  0xca   :  { %1236 = vst [vmem:[%s2075_s1 + $0x40] sm:$0xff] %v942_v8  ;;  %1237 = vst [vmem:[%s2075_s1 + $0x48] sm:$0xff] %v945_v20 }
  0xcb   :  { %1238 = vst [vmem:[%s2075_s1 + $0x50] sm:$0xff] %v948_v9  ;;  %1239 = vst [vmem:[%s2075_s1 + $0x58] sm:$0xff] %v951_v60 }
  0xcc   :  { %1240 = vst [vmem:[%s2075_s1 + $0x60] sm:$0xff] %v954_v62 }
  0xd2   :  { %v1309_v63 = vpop.eup %1308 }
  0xd3   :  { %v1059_v50 = vxor.u32 2147483648, %v1309_v63  ;;  %v1311_v56 = vpop.eup %1310 }
  0xd4   :  { %v1056_v33 = vxor.u32 2147483648, %v1311_v56 }
  0xd5   :  { %v1060_v44 = vsel %vm1058_vm4, %v1059_v50, %v1311_v56  ;;  %v1163_v16 = vsel %vm1161_vm5, %v1059_v50, %v1311_v56 }
  0xd6   :  { %v1057_v39 = vsel %vm1055_vm6, %v1309_v63, %v1056_v33  ;;  %v1160_v5 = vsel %vm1158_vm8, %v1309_v63, %v1056_v33 }
  0xd7   :  { %v1061_v18 = vsel %vm1054_vm9, %v1057_v39, %v1060_v44  ;;  %v1164_v57 = vsel %vm1157_vm7, %v1160_v5, %v1163_v16 }
  0xd8   :  { %v1062_v6 = vsel %vm1051_vm10, nan, %v1061_v18  ;;  %v1165_v43 = vsel %vm1051_vm10, nan, %v1164_v57 }
  0xd9   :  { %v1166_v22 = vmul.f32 %v1062_v6, %v958_v48  ;;  %v1168_v30 = vmul.f32 3.0, %v1165_v43 }
  0xdb   :  { %v1167_v47 = vmul.f32 3.0, %v1166_v22 }
  0xdd   :  { %v1169_v58 = vsub.f32 %v1167_v47, %v1168_v30 }
  0xdf   :  { %v1170_v52 = vmul.f32 %v1169_v58, %v958_v48 }
  0xe1   :  { %v1171_v24 = vsub.f32 %v1170_v52, %v1062_v6 }
  0xe3   :  { %v1172_v23 = vmul.f32 %v1171_v24, %v958_v48 }
  0xe5   :  { %v1173_v42 = vmul.f32 13.101758, %v1172_v23 }
  0xe7   :  { %v1174_v29 = vmul.f32 %v1173_v42, %v1607_v13 }
  0xe9   :  { %v1175_v25 = vmul.f32 %v1174_v29, %v713_v2  ;;  %v1178_v27 = vmul.f32 %v1174_v29, %v715_v61  ;;  %v1181_v0 = vmul.f32 %v1174_v29, %v719_v15  ;;  %v1184_v31 = vmul.f32 %v1174_v29, %v721_v32 }
  0xea   :  { %v1187_v55 = vmul.f32 %v1174_v29, %v723_v41 }
  0xeb   :  { %1249 = vst [vmem:[%s2075_s1 + $0x68] sm:$0xff] %v1175_v25  ;;  %1250 = vst [vmem:[%s2075_s1 + $0x70] sm:$0xff] %v1178_v27 }
  0xec   :  { %1251 = vst [vmem:[%s2075_s1 + $0x78] sm:$0xff] %v1181_v0  ;;  %1252 = vst [vmem:[%s2075_s1 + $0x80] sm:$0xff] %v1184_v31 }
  0xed   :  { %1253 = vst [vmem:[%s2075_s1 + $0x88] sm:$0xff] %v1187_v55 }

</bundles_post_ra>
